<compile_context>
chip_gen: v6e
topology: v6e:2x2x1
jax: 0.10.0
libtpu: 0.0.40
codegen_flags: <defaults>
</compile_context>

<pallas_src>
import jax
import jax.numpy as jnp
from jax.experimental import pallas as pl
from jax.experimental.pallas import tpu as pltpu

IN_SIZE = 156
HIDDEN_SIZE = 500
HIDDEN_PAD = 512          # 500 padded to a clean multiple of the lane width
OUT_SIZE = 2
MAX_TILE_B = 2048         # ~5-7 MB/step incl. double-buffered x tile: fits every generation's
                          # default scoped-VMEM limit (could go 4096 on v6e with a raised limit).


def _cdiv(a, b):
    return (a + b - 1) // b


def _round_up(a, b):
    return _cdiv(a, b) * b


# ---------------------------------------------------------------------------
# Generation detection (static, module-level): tile policy + bf16-EUP choice.
# ---------------------------------------------------------------------------
def _device_kind():
    try:
        return jax.devices()[0].device_kind.lower()
    except Exception:  # pragma: no cover - e.g. no devices during tracing tools
        return ""


_KIND = _device_kind()
_NUM_TENSORCORES = 2 if "v7" in _KIND else 1            # v7x: 2 TensorCores per chip
_USE_BF16_ACT = ("v6" in _KIND) or ("v7" in _KIND)       # v5e has no bf16 EUP/VPU
_HIDDEN_CHUNK = 128 if "v5" in _KIND else 256            # match MXU depth / VMEM pressure


def _choose_tiling(B, num_tc):
    """Pick (tile_b, n_tiles). No forced padding tiles on single-TC chips; even,
    >= 2-steps-per-core tile counts on v7x so its two TensorCores pipeline."""
    B = max(B, 1)
    if num_tc > 1:
        min_tiles = 2 * num_tc if B >= 2 * num_tc * 128 else num_tc
        n_tiles = max(min_tiles, _round_up(_cdiv(B, MAX_TILE_B), num_tc))
        tile_b = min(MAX_TILE_B, _round_up(_cdiv(B, n_tiles), 128))
        n_tiles = _round_up(_cdiv(B, tile_b), num_tc)
    else:
        n_tiles = max(1, _cdiv(B, MAX_TILE_B))
        tile_b = min(MAX_TILE_B, _round_up(_cdiv(B, n_tiles), 128))
        n_tiles = _cdiv(B, tile_b)
    return tile_b, n_tiles


# ---------------------------------------------------------------------------
# Kernel
# ---------------------------------------------------------------------------
def _make_kernel(tile_b, chunk, use_bf16_act):
    n_chunks = HIDDEN_PAD // chunk
    f32, bf16 = jnp.float32, jnp.bfloat16

    def kernel(x_ref, w1_ref, b1_ref, dw_ref, db_ref, o_ref):
        # x:  (tile_b, 156) f32   -- native layout, single HBM read; cast to bf16 here
        # w1: (156, 512)    bf16  -- hidden zero-padded 500->512
        # b1: (1, 512)      f32
        # dw: (1, 512)      f32   -- w2[:,1]-w2[:,0], zero-padded (must stay 0 in cols 500..511)
        # db: (1, 1)        f32   -- b2[1]-b2[0]
        # o:  (tile_b, 2)   f32   -- col 0 = P(class 0), col 1 = P(class 1)
        xb = x_ref[...].astype(bf16)                       # (tile_b, 156), cast hidden under MXU
        d = jnp.zeros((tile_b, 1), f32)                    # layer-2 logit-difference accumulator

        # Chunk the hidden dim so the full (tile_b, 512) f32 activation never materializes;
        # each chunk: MXU matmul -> f32 bias add -> EUP sigmoid -> VPU mul -> XLU lane-reduce.
        for c in range(n_chunks):
            lo = c * chunk
            zc = jnp.dot(xb, w1_ref[:, lo:lo + chunk],
                         preferred_element_type=f32)       # (tile_b, chunk), bf16 MXU, f32 acc
            # NOTE: b1 could be folded into the matmul (K 156->157) if VALU ever binds; kept as a
            # separate f32 add for precision parity with the f32 PyTorch module.
            zc = zc + b1_ref[:, lo:lo + chunk]
            if use_bf16_act:
                zc = zc.astype(bf16)                       # bf16 EUP path (v6e/v7x only)
            hc = 0.5 * jnp.tanh(0.5 * zc) + 0.5            # sigmoid via EUP tanh
            # Padded hidden cols give sigmoid(0)=0.5 but dw is zero there -> exact no-op.
            d = d + jnp.sum(hc.astype(f32) * dw_ref[:, lo:lo + chunk],
                            axis=1, keepdims=True)         # f32 accumulate, XLU lane reduce

        p1 = 0.5 * jnp.tanh(0.5 * (d + db_ref[...])) + 0.5  # softmax(2) == sigmoid(logit diff)
        o_ref[:, 0:1] = 1.0 - p1
        o_ref[:, 1:2] = p1

    return kernel


# ---------------------------------------------------------------------------
# Parameter prep (call ONCE, keep resident in this layout for a serving loop)
# ---------------------------------------------------------------------------
def prepare_params(w1, b1, w2, b2):
    """w1:(156,500) b1:(1,500) w2:(500,2) b2:(1,2)  ->  kernel-layout params."""
    assert w1.shape == (IN_SIZE, HIDDEN_SIZE)
    assert w2.shape == (HIDDEN_SIZE, OUT_SIZE)
    f32, bf16 = jnp.float32, jnp.bfloat16
    # Padded hidden columns [500, 512) MUST be zero in BOTH w1p and dwr so padded units cancel.
    w1p = jnp.zeros((IN_SIZE, HIDDEN_PAD), bf16).at[:, :HIDDEN_SIZE].set(w1.astype(bf16))
    b1r = jnp.zeros((1, HIDDEN_PAD), f32).at[0, :HIDDEN_SIZE].set(b1.reshape(-1).astype(f32))
    dw = (w2[:, 1] - w2[:, 0]).astype(f32)                 # difference in f32 (can be small)
    dwr = jnp.zeros((1, HIDDEN_PAD), f32).at[0, :HIDDEN_SIZE].set(dw)
    b2f = b2.reshape(-1).astype(f32)
    db = (b2f[1] - b2f[0]).reshape(1, 1)
    return w1p, b1r, dwr, db


# ---------------------------------------------------------------------------
# Forward
# ---------------------------------------------------------------------------
def simple_nn_forward(x, params, *, tile_b=None):
    w1p, b1r, dwr, db = params
    B = x.shape[0]
    assert x.shape == (B, IN_SIZE)

    if tile_b is None:
        tile_b, n_tiles = _choose_tiling(B, _NUM_TENSORCORES)
    else:
        assert tile_b % 128 == 0
        n_tiles = _cdiv(B, tile_b)
    b_pad = n_tiles * tile_b

    # Only pad the ragged batch tail (zeros -> finite garbage rows, sliced off below).
    xin = x if b_pad == B else jnp.pad(x, ((0, b_pad - B), (0, 0)))

    kernel = _make_kernel(tile_b, _HIDDEN_CHUNK, _USE_BF16_ACT)

    probs = pl.pallas_call(
        kernel,
        out_shape=jax.ShapeDtypeStruct((b_pad, OUT_SIZE), jnp.float32),
        grid_spec=pltpu.PrefetchScalarGridSpec(
            num_scalar_prefetch=0,
            grid=(n_tiles,),
            in_specs=[
                # x tile: the only per-step stream; double-buffered by default.
                pl.BlockSpec((tile_b, IN_SIZE), lambda i: (i, 0)),
                # Grid-invariant parameters: single-buffered (fetched once, no redundant DMA).
                pl.BlockSpec((IN_SIZE, HIDDEN_PAD), lambda i: (0, 0),
                             pipeline_mode=pl.Buffered(1)),
                pl.BlockSpec((1, HIDDEN_PAD), lambda i: (0, 0),
                             pipeline_mode=pl.Buffered(1)),
                pl.BlockSpec((1, HIDDEN_PAD), lambda i: (0, 0),
                             pipeline_mode=pl.Buffered(1)),
                pl.BlockSpec((1, 1), lambda i: (0, 0),
                             pipeline_mode=pl.Buffered(1)),
            ],
            out_specs=pl.BlockSpec((tile_b, OUT_SIZE), lambda i: (i, 0)),
        ),
        compiler_params=pltpu.CompilerParams(
            dimension_semantics=("parallel",),
        ),
    )(xin, w1p, b1r, dwr, db)

    return probs[:B, :]


# ---------------------------------------------------------------------------
# References
# ---------------------------------------------------------------------------
def reference_forward(x, w1, b1, w2, b2):
    """Pure f32 reference (matches the PyTorch module exactly)."""
    h = jax.nn.sigmoid(x @ w1 + b1)
    return jax.nn.softmax(h @ w2 + b2, axis=1)


def reference_forward_mirrored(x, w1, b1, w2, b2, use_bf16_act):
    """Reference mirroring the kernel's precision choices (bf16 MXU inputs, f32 acc,
    optional bf16 activation, sigmoid-of-logit-difference layer 2)."""
    f32, bf16 = jnp.float32, jnp.bfloat16
    z = jnp.dot(x.astype(bf16), w1.astype(bf16), preferred_element_type=f32) + b1.astype(f32)
    if use_bf16_act:
        z = z.astype(bf16)
    h = (0.5 * jnp.tanh(0.5 * z) + 0.5).astype(f32)
    dw = (w2[:, 1] - w2[:, 0]).astype(f32)
    db = (b2.reshape(-1)[1] - b2.reshape(-1)[0]).astype(f32)
    d = h @ dw + db
    p1 = 0.5 * jnp.tanh(0.5 * d) + 0.5
    return jnp.stack([1.0 - p1, p1], axis=1)


if __name__ == "__main__":
    key = jax.random.PRNGKey(0)
    kx, kw1, kb1, kw2, kb2 = jax.random.split(key, 5)

    B = 8  # small demo batch; wrapper pads to one (or two on v7x) 128-row tile(s)
    x = jax.random.normal(kx, (B, IN_SIZE), dtype=jnp.float32)

    # Deterministic parameter init (uniform, PyTorch-Linear-like bounds)
    bound1 = 1.0 / (IN_SIZE ** 0.5)
    w1 = jax.random.uniform(kw1, (IN_SIZE, HIDDEN_SIZE), jnp.float32, -bound1, bound1)
    b1 = jax.random.uniform(kb1, (1, HIDDEN_SIZE), jnp.float32, -bound1, bound1)
    bound2 = 1.0 / (HIDDEN_SIZE ** 0.5)
    w2 = jax.random.uniform(kw2, (HIDDEN_SIZE, OUT_SIZE), jnp.float32, -bound2, bound2)
    b2 = jax.random.uniform(kb2, (1, OUT_SIZE), jnp.float32, -bound2, bound2)

    params = prepare_params(w1, b1, w2, b2)   # hoisted: once per model, not per call
    fwd = jax.jit(simple_nn_forward)
    out = jax.block_until_ready(fwd(x, params))

    assert out.shape == (B, OUT_SIZE)
    assert bool(jnp.all(jnp.isfinite(out)))
    # rows of the softmax sum to 1
    assert jnp.allclose(jnp.sum(out, axis=1), jnp.ones((B,)), atol=1e-5)
    # check vs a reference mirroring the kernel's precision choices
    mirror_atol = 7.5e-3 if _USE_BF16_ACT else 1e-3
    ref_m = reference_forward_mirrored(x, w1, b1, w2, b2, _USE_BF16_ACT)
    assert jnp.allclose(out, ref_m, atol=mirror_atol), "mismatch vs precision-mirrored reference"
    # looser check vs the pure-f32 module semantics (bf16 quantization only)
    ref_f = reference_forward(x, w1, b1, w2, b2)
    assert jnp.allclose(out, ref_f, atol=2.5e-2), "mismatch vs f32 reference"

    print("KERNEL_OK")
</pallas_src>

<mosaic_0001>
module attributes {stable_mosaic.version = 11 : i64} {
  func.func @kernel(%arg0: i32, %arg1: memref<128x156xf32, #tpu.memory_space<vmem>>, %arg2: memref<156x512xbf16, #tpu.memory_space<vmem>>, %arg3: memref<1x512xf32, #tpu.memory_space<vmem>>, %arg4: memref<1x512xf32, #tpu.memory_space<vmem>>, %arg5: memref<1x1xf32, #tpu.memory_space<vmem>>, %arg6: memref<128x2xf32, #tpu.memory_space<vmem>>) attributes {dimension_semantics = [#tpu.dimension_semantics<parallel>], iteration_bounds = array<i64: 1>, scalar_prefetch = 0 : i64, scratch_operands = 0 : i64, tpu.core_type = #tpu.core_type<tc>, window_params = [{transform_indices = @transform_0, window_bounds = array<i64: 128, 156>}, {pipeline_mode = #tpu.pipeline_mode<synchronous>, transform_indices = @transform_1, window_bounds = array<i64: 156, 512>}, {pipeline_mode = #tpu.pipeline_mode<synchronous>, transform_indices = @transform_2, window_bounds = array<i64: 1, 512>}, {pipeline_mode = #tpu.pipeline_mode<synchronous>, transform_indices = @transform_3, window_bounds = array<i64: 1, 512>}, {pipeline_mode = #tpu.pipeline_mode<synchronous>, transform_indices = @transform_4, window_bounds = array<i64: 1, 1>}, {transform_indices = @transform_5, window_bounds = array<i64: 128, 2>}]} {
    %c0 = arith.constant 0 : index
    %c0_0 = arith.constant 0 : index
    %0 = vector.load %arg1[%c0, %c0_0] : memref<128x156xf32, #tpu.memory_space<vmem>>, vector<128x156xf32>
    %1 = arith.truncf %0 : vector<128x156xf32> to vector<128x156xbf16>
    %cst = arith.constant 0.000000e+00 : f32
    %2 = vector.broadcast %cst : f32 to vector<128x1xf32>
    %c0_1 = arith.constant 0 : index
    %c0_2 = arith.constant 0 : index
    %3 = vector.load %arg2[%c0_1, %c0_2] : memref<156x512xbf16, #tpu.memory_space<vmem>>, vector<156x256xbf16>
    %cst_3 = arith.constant dense<0.000000e+00> : vector<128x256xf32>
    %4 = tpu.matmul %1, %3, %cst_3 {dimension_numbers = #tpu.dot_dimension_numbers<[1], [0], [0], [1], [0, 0, 1, 1], [], []>} : vector<128x156xbf16>, vector<156x256xbf16>, vector<128x256xf32> -> vector<128x256xf32>
    %c0_4 = arith.constant 0 : index
    %c0_5 = arith.constant 0 : index
    %5 = vector.load %arg3[%c0_4, %c0_5] : memref<1x512xf32, #tpu.memory_space<vmem>>, vector<1x256xf32>
    %6 = vector.broadcast %5 : vector<1x256xf32> to vector<128x256xf32>
    %7 = arith.addf %4, %6 : vector<128x256xf32>
    %cst_6 = arith.constant 5.000000e-01 : f32
    %8 = vector.broadcast %cst_6 : f32 to vector<128x256xf32>
    %9 = arith.mulf %8, %7 : vector<128x256xf32>
    %10 = math.tanh %9 : vector<128x256xf32>
    %cst_7 = arith.constant 5.000000e-01 : f32
    %11 = vector.broadcast %cst_7 : f32 to vector<128x256xf32>
    %12 = arith.mulf %11, %10 : vector<128x256xf32>
    %cst_8 = arith.constant 5.000000e-01 : f32
    %13 = vector.broadcast %cst_8 : f32 to vector<128x256xf32>
    %14 = arith.addf %12, %13 : vector<128x256xf32>
    %c0_9 = arith.constant 0 : index
    %c0_10 = arith.constant 0 : index
    %15 = vector.load %arg4[%c0_9, %c0_10] : memref<1x512xf32, #tpu.memory_space<vmem>>, vector<1x256xf32>
    %16 = vector.broadcast %15 : vector<1x256xf32> to vector<128x256xf32>
    %17 = arith.mulf %14, %16 : vector<128x256xf32>
    %cst_11 = arith.constant dense<0.000000e+00> : vector<128xf32>
    %18 = vector.multi_reduction <add>, %17, %cst_11 [1] : vector<128x256xf32> to vector<128xf32>
    %19 = vector.shape_cast %18 : vector<128xf32> to vector<128x1xf32>
    %20 = arith.addf %2, %19 : vector<128x1xf32>
    %c0_12 = arith.constant 0 : index
    %c256 = arith.constant 256 : index
    %21 = vector.load %arg2[%c0_12, %c256] : memref<156x512xbf16, #tpu.memory_space<vmem>>, vector<156x256xbf16>
    %cst_13 = arith.constant dense<0.000000e+00> : vector<128x256xf32>
    %22 = tpu.matmul %1, %21, %cst_13 {dimension_numbers = #tpu.dot_dimension_numbers<[1], [0], [0], [1], [0, 0, 1, 1], [], []>} : vector<128x156xbf16>, vector<156x256xbf16>, vector<128x256xf32> -> vector<128x256xf32>
    %c0_14 = arith.constant 0 : index
    %c256_15 = arith.constant 256 : index
    %23 = vector.load %arg3[%c0_14, %c256_15] : memref<1x512xf32, #tpu.memory_space<vmem>>, vector<1x256xf32>
    %24 = vector.broadcast %23 : vector<1x256xf32> to vector<128x256xf32>
    %25 = arith.addf %22, %24 : vector<128x256xf32>
    %cst_16 = arith.constant 5.000000e-01 : f32
    %26 = vector.broadcast %cst_16 : f32 to vector<128x256xf32>
    %27 = arith.mulf %26, %25 : vector<128x256xf32>
    %28 = math.tanh %27 : vector<128x256xf32>
    %cst_17 = arith.constant 5.000000e-01 : f32
    %29 = vector.broadcast %cst_17 : f32 to vector<128x256xf32>
    %30 = arith.mulf %29, %28 : vector<128x256xf32>
    %cst_18 = arith.constant 5.000000e-01 : f32
    %31 = vector.broadcast %cst_18 : f32 to vector<128x256xf32>
    %32 = arith.addf %30, %31 : vector<128x256xf32>
    %c0_19 = arith.constant 0 : index
    %c256_20 = arith.constant 256 : index
    %33 = vector.load %arg4[%c0_19, %c256_20] : memref<1x512xf32, #tpu.memory_space<vmem>>, vector<1x256xf32>
    %34 = vector.broadcast %33 : vector<1x256xf32> to vector<128x256xf32>
    %35 = arith.mulf %32, %34 : vector<128x256xf32>
    %cst_21 = arith.constant dense<0.000000e+00> : vector<128xf32>
    %36 = vector.multi_reduction <add>, %35, %cst_21 [1] : vector<128x256xf32> to vector<128xf32>
    %37 = vector.shape_cast %36 : vector<128xf32> to vector<128x1xf32>
    %38 = arith.addf %20, %37 : vector<128x1xf32>
    %c0_22 = arith.constant 0 : index
    %c0_23 = arith.constant 0 : index
    %39 = vector.load %arg5[%c0_22, %c0_23] : memref<1x1xf32, #tpu.memory_space<vmem>>, vector<1x1xf32>
    %40 = vector.broadcast %39 : vector<1x1xf32> to vector<128x1xf32>
    %41 = arith.addf %38, %40 : vector<128x1xf32>
    %cst_24 = arith.constant 5.000000e-01 : f32
    %42 = vector.broadcast %cst_24 : f32 to vector<128x1xf32>
    %43 = arith.mulf %42, %41 : vector<128x1xf32>
    %44 = math.tanh %43 : vector<128x1xf32>
    %cst_25 = arith.constant 5.000000e-01 : f32
    %45 = vector.broadcast %cst_25 : f32 to vector<128x1xf32>
    %46 = arith.mulf %45, %44 : vector<128x1xf32>
    %cst_26 = arith.constant 5.000000e-01 : f32
    %47 = vector.broadcast %cst_26 : f32 to vector<128x1xf32>
    %48 = arith.addf %46, %47 : vector<128x1xf32>
    %cst_27 = arith.constant 1.000000e+00 : f32
    %49 = vector.broadcast %cst_27 : f32 to vector<128x1xf32>
    %50 = arith.subf %49, %48 : vector<128x1xf32>
    %c0_28 = arith.constant 0 : index
    %c0_29 = arith.constant 0 : index
    %51 = vector.load %arg6[%c0_28, %c0_29] : memref<128x2xf32, #tpu.memory_space<vmem>>, vector<128x1xf32>
    tpu.vector_store %arg6[%c0_28, %c0_29], %50 {strides = array<i32>} : memref<128x2xf32, #tpu.memory_space<vmem>>, vector<128x1xf32>,
    %c0_30 = arith.constant 0 : index
    %c1 = arith.constant 1 : index
    %52 = vector.load %arg6[%c0_30, %c1] : memref<128x2xf32, #tpu.memory_space<vmem>>, vector<128x1xf32>
    tpu.vector_store %arg6[%c0_30, %c1], %48 {strides = array<i32>} : memref<128x2xf32, #tpu.memory_space<vmem>>, vector<128x1xf32>,
    return
  }
  func.func @transform_0(%arg0: i32) -> (i32, i32) {
    %c0_i32 = arith.constant 0 : i32
    %c0_i32_0 = arith.constant 0 : i32
    return %arg0, %c0_i32 : i32, i32
  }
  func.func @transform_1(%arg0: i32) -> (i32, i32) {
    %c0_i32 = arith.constant 0 : i32
    %c0_i32_0 = arith.constant 0 : i32
    %c0_i32_1 = arith.constant 0 : i32
    return %c0_i32, %c0_i32_0 : i32, i32
  }
  func.func @transform_2(%arg0: i32) -> (i32, i32) {
    %c0_i32 = arith.constant 0 : i32
    %c0_i32_0 = arith.constant 0 : i32
    %c0_i32_1 = arith.constant 0 : i32
    return %c0_i32, %c0_i32_0 : i32, i32
  }
  func.func @transform_3(%arg0: i32) -> (i32, i32) {
    %c0_i32 = arith.constant 0 : i32
    %c0_i32_0 = arith.constant 0 : i32
    %c0_i32_1 = arith.constant 0 : i32
    return %c0_i32, %c0_i32_0 : i32, i32
  }
  func.func @transform_4(%arg0: i32) -> (i32, i32) {
    %c0_i32 = arith.constant 0 : i32
    %c0_i32_0 = arith.constant 0 : i32
    %c0_i32_1 = arith.constant 0 : i32
    return %c0_i32, %c0_i32_0 : i32, i32
  }
  func.func @transform_5(%arg0: i32) -> (i32, i32) {
    %c0_i32 = arith.constant 0 : i32
    %c0_i32_0 = arith.constant 0 : i32
    return %arg0, %c0_i32 : i32, i32
  }
}

</mosaic_0001>

<bundles_post_ra>
// kernel: simple_nn_forward.1
= control target key start
LH: loop header
LB: loop body
LE: loop exit
PB: predicated region body
PF: predicated region fallthrough
CT: control target
= control target key end

     0   :  { %s2200_s0 = inlined_call_operand.vmem [shape: f32[128,156], index: 0, kind: input, shape index: {}]   ;;  %s2201_s1 = inlined_call_operand.hbm [shape: bf16[156,512], index: 1, kind: input, shape index: {}]   ;;  %s2202_s2 = inlined_call_operand.vmem [shape: f32[1,512], index: 2, kind: input, shape index: {}]   ;;  %s2203_s3 = inlined_call_operand.vmem [shape: f32[1,512], index: 3, kind: input, shape index: {}]   ;;  %s2204_s4 = inlined_call_operand.<no memory space> [shape: f32[1,1], index: 4, kind: input, shape index: {}]   ;;  %s2205_s5 = inlined_call_operand.vmem [shape: f32[128,2], index: 5, kind: output, shape index: {}]  }
   0x1   :  { %v10_v0 = vstv %s2204_s4 }
   0x2   :  { %11 = vst [vmem:[#allocation2] sm:$0x1] %v10_v0 }
   0x3   :  { %12 = vsyncpa [#allocation4], 0  ;;  %s1592_s20 = smov [#allocation3]  }
   0x4   :  { %s20_s21 = sshll.u32 %s1592_s20, 4  ;;  %s21_s21 = int_to_ptr.vmem [resolvable:$true] %s20_s21 }
   0x5   :  { %s1578_s22 = scalar_lea.vmem %s21_s21, 5120  ;;  %p1583_p1 = scmp.lt.s32.totalorder %s21_s21, %s21_s21 }
   0x6   :  { %p1579_p0 = scmp.ne.s32.totalorder %s21_s21, %s1578_s22  ;;  %p1584_p2 = scmp.lt.s32.totalorder %s1578_s22, %s1578_s22 }
   0x8   :  { %p1585_p3 = por %p1584_p2, %p1583_p1 }
   0xa   :  { %p1586_p4 = pnand %p1585_p3, %p1579_p0 }
   0xc   :  { %1589 = shalt.err (!%p1586_p4)
}
   0xd   :  { %s1593_s23 = smov 256   ;;  %s1594_s24 = smov 16  }
   0xe   :  { %26 = dma.hbm_to_vmem [thread:$0]  %s2201_s1, 5120, %s21_s21, [#allocation4], %s1593_s23, %s1593_s23, %s1594_s24  }
   0xf   :  { %1590 = dma.done.wait [#allocation4], 5120  }
  0x10   :  { %1591 = vsyncadd [#allocation4], 4294962176  ;;  %v1350_v1 = vld [vmem:[#allocation3 + $0xe4] ss:$16 sps:$4 sm:$0xff]   ;;  %v1352_v2 = vld [vmem:[#allocation3 + $0xec] ss:$16 sps:$4 sm:$0xff]  }
  0x11   :  { %247 = vmatprep.subr.bf16.mxu0 %v1350_v1  ;;  %v1354_v3 = vld [vmem:[#allocation3 + $0xe0] ss:$16 sps:$4 sm:$0xff]   ;;  %v1355_v4 = vld [vmem:[#allocation3 + $0xe8] ss:$16 sps:$4 sm:$0xff]   ;;  %732 = vmatprep.subr.bf16.mxu1 %v1352_v2  ;;  %v1356_v5 = vld [vmem:[#allocation3 + $0xc4] ss:$16 sps:$4 sm:$0xff]  }
  0x12   :  { %248 = vmatpush1.bf16.msra.mxu0 %v1354_v3  ;;  %733 = vmatpush1.bf16.msra.mxu1 %v1355_v4  ;;  %v1358_v6 = vld [vmem:[#allocation3 + $0xcc] ss:$16 sps:$4 sm:$0xff]   ;;  %v1360_v7 = vld [vmem:[#allocation3 + $0xc0] ss:$16 sps:$4 sm:$0xff]   ;;  %v1361_v8 = vld [vmem:[#allocation3 + $0xc8] ss:$16 sps:$4 sm:$0xff]  }
  0x13   :  { %249 = vmatprep.subr.bf16.mxu0 %v1356_v5  ;;  %734 = vmatprep.subr.bf16.mxu1 %v1358_v6  ;;  %v1362_v9 = vld [vmem:[#allocation3 + $0xa4] ss:$16 sps:$4 sm:$0xff]   ;;  %v1364_v10 = vld [vmem:[#allocation3 + $0xac] ss:$16 sps:$4 sm:$0xff]   ;;  %v1366_v11 = vld [vmem:[#allocation3 + $0xa0] ss:$16 sps:$4 sm:$0xff]  }
  0x14   :  { %v1367_v12 = vld [vmem:[#allocation3 + $0xa8] ss:$16 sps:$4 sm:$0xff]   ;;  %v1368_v13 = vld [vmem:[#allocation3 + $0x84] ss:$16 sps:$4 sm:$0xff]   ;;  %v1370_v14 = vld [vmem:[#allocation3 + $0x8c] ss:$16 sps:$4 sm:$0xff]  }
  0x15   :  { %v1372_v15 = vld [vmem:[#allocation3 + $0x80] ss:$16 sps:$4 sm:$0xff]   ;;  %v1373_v16 = vld [vmem:[#allocation3 + $0x88] ss:$16 sps:$4 sm:$0xff]   ;;  %v1374_v17 = vld [vmem:[#allocation3 + $0x64] ss:$16 sps:$4 sm:$0xff]  }
  0x16   :  { %250 = vmatpush1.bf16.msra.mxu0 %v1360_v7  ;;  %735 = vmatpush1.bf16.msra.mxu1 %v1361_v8  ;;  %v1376_v18 = vld [vmem:[#allocation3 + $0x6c] ss:$16 sps:$4 sm:$0xff]   ;;  %v1378_v19 = vld [vmem:[#allocation3 + $0x60] ss:$16 sps:$4 sm:$0xff]   ;;  %v1379_v20 = vld [vmem:[#allocation3 + $0x68] ss:$16 sps:$4 sm:$0xff]  }
  0x17   :  { %251 = vmatprep.subr.bf16.mxu0 %v1362_v9  ;;  %736 = vmatprep.subr.bf16.mxu1 %v1364_v10  ;;  %v1380_v21 = vld [vmem:[#allocation3 + $0x44] ss:$16 sps:$4 sm:$0xff]   ;;  %v1382_v22 = vld [vmem:[#allocation3 + $0x4c] ss:$16 sps:$4 sm:$0xff]   ;;  %v1384_v23 = vld [vmem:[#allocation3 + $0x40] ss:$16 sps:$4 sm:$0xff]  }
  0x18   :  { %v1385_v24 = vld [vmem:[#allocation3 + $0x48] ss:$16 sps:$4 sm:$0xff]   ;;  %v1386_v25 = vld [vmem:[#allocation3 + $0x24] ss:$16 sps:$4 sm:$0xff]   ;;  %v1388_v26 = vld [vmem:[#allocation3 + $0x2c] ss:$16 sps:$4 sm:$0xff]  }
  0x19   :  { %v1390_v27 = vld [vmem:[#allocation3 + $0x20] ss:$16 sps:$4 sm:$0xff]   ;;  %v1391_v28 = vld [vmem:[#allocation3 + $0x28] ss:$16 sps:$4 sm:$0xff]   ;;  %v1392_v29 = vld [vmem:[#allocation3 + $0x4] ss:$16 sps:$4 sm:$0xff]  }
  0x1a   :  { %252 = vmatpush1.bf16.msra.mxu0 %v1366_v11  ;;  %737 = vmatpush1.bf16.msra.mxu1 %v1367_v12  ;;  %v1394_v30 = vld [vmem:[#allocation3 + $0xc] ss:$16 sps:$4 sm:$0xff]   ;;  %v1396_v32 = vld [vmem:[#allocation3] ss:$16 sps:$4 sm:$0xff]   ;;  %v1397_v33 = vld [vmem:[#allocation3 + $0x8] ss:$16 sps:$4 sm:$0xff]  }
  0x1b   :  { %253 = vmatprep.subr.bf16.mxu0 %v1368_v13  ;;  %738 = vmatprep.subr.bf16.mxu1 %v1370_v14  ;;  %v38_v31 = vld [vmem:[%s2200_s0 + $0x8] sm:$0xff]  ;;  %v40_v34 = vld [vmem:[%s2200_s0 + $0x18] sm:$0xff]  ;;  %vm215_vm0 = vcmask 228352   ;;  %v1402_v38 = vld [vmem:[#allocation3 + $0x120] ss:$16 sps:$4 sm:$0x3f]  }
  0x1c   :  { %v1398_v35 = vld [vmem:[#allocation3 + $0x124] ss:$16 sps:$4 sm:$0x3f]   ;;  %v1400_v36 = vld [vmem:[#allocation3 + $0x12c] ss:$16 sps:$4 sm:$0x3f]   ;;  %v70_v37 = vpack.c.bf16 %v40_v34, %v38_v31 }
  0x1d   :  { %v1403_v39 = vld [vmem:[#allocation3 + $0x128] ss:$16 sps:$4 sm:$0x3f]   ;;  %vm240_vm1 = vcmask 1045504   ;;  %v1404_v42 = vld [vmem:[#allocation3 + $0x104] ss:$16 sps:$4 sm:$0xff]  }
  0x1e   :  { %254 = vmatpush1.bf16.msra.mxu0 %v1372_v15  ;;  %739 = vmatpush1.bf16.msra.mxu1 %v1373_v16  ;;  %v242_v40 = vsel %vm240_vm1, %v1402_v38, 0  ;;  %v727_v41 = vsel %vm240_vm1, %v1403_v39, 0  ;;  %v1406_v43 = vld [vmem:[#allocation3 + $0x10c] ss:$16 sps:$4 sm:$0xff]   ;;  %v1408_v44 = vld [vmem:[#allocation3 + $0x100] ss:$16 sps:$4 sm:$0xff]  }
  0x1f   :  { %255 = vmatprep.subr.bf16.mxu0 %v1374_v17  ;;  %740 = vmatprep.subr.bf16.mxu1 %v1376_v18  ;;  %v1409_v45 = vld [vmem:[#allocation3 + $0x108] ss:$16 sps:$4 sm:$0xff]   ;;  %v37_v46 = vld [vmem:[%s2200_s0] sm:$0xff]  ;;  %v39_v47 = vld [vmem:[%s2200_s0 + $0x10] sm:$0xff]  ;;  %vm1184_vm2 = vcmask 7168   ;;  %vm1265_vm3 = vcmask 15368  }
  0x20   :  { %1308 = vmatprep.mubr.msk.bf16.mxu0 %vm215_vm0, %v70_v37  ;;  %1337 = vmatprep.mubr.msk.bf16.mxu1 %vm215_vm0, %v70_v37  ;;  %v42_v48 = vld [vmem:[%s2200_s0 + $0x28] sm:$0xff]  ;;  %v44_v49 = vld [vmem:[%s2200_s0 + $0x38] sm:$0xff]  ;;  %v69_v50 = vpack.c.bf16 %v39_v47, %v37_v46  ;;  %v41_v52 = vld [vmem:[%s2200_s0 + $0x20] sm:$0xff] }
  0x21   :  { %v72_v51 = vpack.c.bf16 %v44_v49, %v42_v48  ;;  %v43_v53 = vld [vmem:[%s2200_s0 + $0x30] sm:$0xff]  ;;  %v46_v54 = vld [vmem:[%s2200_s0 + $0x48] sm:$0xff]  ;;  %v48_v55 = vld [vmem:[%s2200_s0 + $0x58] sm:$0xff] }
  0x22   :  { %256 = vmatpush1.bf16.msra.mxu0 %v1378_v19  ;;  %741 = vmatpush1.bf16.msra.mxu1 %v1379_v20  ;;  %v71_v56 = vpack.c.bf16 %v43_v53, %v41_v52  ;;  %v74_v57 = vpack.c.bf16 %v48_v55, %v46_v54  ;;  %v45_v58 = vld [vmem:[%s2200_s0 + $0x40] sm:$0xff]  ;;  %v47_v59 = vld [vmem:[%s2200_s0 + $0x50] sm:$0xff]  ;;  %v50_v60 = vld [vmem:[%s2200_s0 + $0x68] sm:$0xff] }
  0x23   :  { %257 = vmatprep.subr.bf16.mxu0 %v1380_v21  ;;  %742 = vmatprep.subr.bf16.mxu1 %v1382_v22  ;;  %v52_v61 = vld [vmem:[%s2200_s0 + $0x78] sm:$0xff]  ;;  %v73_v62 = vpack.c.bf16 %v47_v59, %v45_v58  ;;  %v49_v0 = vld [vmem:[%s2200_s0 + $0x60] sm:$0xff]  ;;  %v51_v1 = vld [vmem:[%s2200_s0 + $0x70] sm:$0xff] }
  0x24   :  { %v76_v63 = vpack.c.bf16 %v52_v61, %v50_v60  ;;  %v54_v2 = vld [vmem:[%s2200_s0 + $0x88] sm:$0xff]  ;;  %v56_v3 = vld [vmem:[%s2200_s0 + $0x98] sm:$0xff]  ;;  %v75_v4 = vpack.c.bf16 %v51_v1, %v49_v0  ;;  %v53_v6 = vld [vmem:[%s2200_s0 + $0x80] sm:$0xff] }
  0x25   :  { %v78_v5 = vpack.c.bf16 %v56_v3, %v54_v2  ;;  %v55_v7 = vld [vmem:[%s2200_s0 + $0x90] sm:$0xff]  ;;  %v58_v8 = vld [vmem:[%s2200_s0 + $0xa8] sm:$0xff]  ;;  %v60_v9 = vld [vmem:[%s2200_s0 + $0xb8] sm:$0xff] }
  0x26   :  { %258 = vmatpush1.bf16.msra.mxu0 %v1384_v23  ;;  %743 = vmatpush1.bf16.msra.mxu1 %v1385_v24  ;;  %v77_v10 = vpack.c.bf16 %v55_v7, %v53_v6  ;;  %v80_v11 = vpack.c.bf16 %v60_v9, %v58_v8  ;;  %v57_v12 = vld [vmem:[%s2200_s0 + $0xa0] sm:$0xff]  ;;  %v59_v13 = vld [vmem:[%s2200_s0 + $0xb0] sm:$0xff]  ;;  %v62_v14 = vld [vmem:[%s2200_s0 + $0xc8] sm:$0xff] }
  0x27   :  { %259 = vmatprep.subr.bf16.mxu0 %v1386_v25  ;;  %744 = vmatprep.subr.bf16.mxu1 %v1388_v26  ;;  %v64_v15 = vld [vmem:[%s2200_s0 + $0xd8] sm:$0xff]  ;;  %v79_v16 = vpack.c.bf16 %v59_v13, %v57_v12  ;;  %v61_v18 = vld [vmem:[%s2200_s0 + $0xc0] sm:$0xff]  ;;  %v63_v19 = vld [vmem:[%s2200_s0 + $0xd0] sm:$0xff] }
  0x28   :  { %v82_v17 = vpack.c.bf16 %v64_v15, %v62_v14  ;;  %v66_v20 = vld [vmem:[%s2200_s0 + $0xe8] sm:$0xff]  ;;  %v68_v21 = vld [vmem:[%s2200_s0 + $0xf8] sm:$0xff]  ;;  %v81_v22 = vpack.c.bf16 %v63_v19, %v61_v18  ;;  %v65_v24 = vld [vmem:[%s2200_s0 + $0xe0] sm:$0xff] }
  0x29   :  { %v84_v23 = vpack.c.bf16 %v68_v21, %v66_v20  ;;  %v67_v25 = vld [vmem:[%s2200_s0 + $0xf0] sm:$0xff]  ;;  %v616_v31 = vld [vmem:[%s2202_s2 + $0x2] sm:$0x3] }
  0x2a   :  { %260 = vmatpush1.bf16.msra.mxu0 %v1390_v27  ;;  %745 = vmatpush1.bf16.msra.mxu1 %v1391_v28  ;;  %v83_v26 = vpack.c.bf16 %v67_v25, %v65_v24  ;;  %v107_v27 = vlaneseq }
  0x2b   :  { %261 = vmatprep.subr.bf16.mxu0 %v1392_v29  ;;  %746 = vmatprep.subr.bf16.mxu1 %v1394_v30  ;;  %v105_v30 = vld [vmem:[%s2202_s2] sm:$0x3] }
  0x2c   :  { %v108_v28 = vshrl.u32 %v107_v27, 7  ;;  %v488_v27 = vld [vmem:[%s2203_s3] sm:$0x3] }
  0x2e   :  { %262 = vmatpush1.bf16.msra.mxu0 %v1396_v32  ;;  %747 = vmatpush1.bf16.msra.mxu1 %v1397_v33  ;;  %v1744_v29 = vsub.s32 0, %v108_v28  ;;  %v1752_v32 = vsub.s32 1, %v108_v28 }
  0x2f   :  { %1307 = vmatprep.subr.msk.bf16.mxu0 %vm240_vm1, %v1398_v35  ;;  %1336 = vmatprep.subr.msk.bf16.mxu1 %vm240_vm1, %v1400_v36 }
  0x30   :  { %v1755_v33 = vrot.slane %v105_v30, %v1744_v29  ;;  %v1758_v34 = vrot.slane %v616_v31, %v1744_v29  ;;  %v1761_v35 = vrot.slane %v105_v30, %v1752_v32  ;;  %v1764_v36 = vrot.slane %v616_v31, %v1752_v32 }
  0x32   :  { %276 = vmatpush2.bf16.msra.mxu0 %v242_v40  ;;  %761 = vmatpush2.bf16.msra.mxu1 %v727_v41 }
  0x33   :  { %277 = vmatprep.subr.bf16.mxu0 %v1404_v42  ;;  %762 = vmatprep.subr.bf16.mxu1 %v1406_v43 }
  0x36   :  { %278 = vmatpush2.bf16.msra.mxu0 %v1408_v44  ;;  %763 = vmatpush2.bf16.msra.mxu1 %v1409_v45 }
  0x39   :  { %280 = vmatmul.mubr.bf16.vlgmr.msra.gmra.mxu0 %v69_v50  ;;  %765 = vmatmul.mubr.bf16.vlgmr.msra.gmra.mxu1 %v69_v50 }
  0x3a   :  { %1309 = vmatprep.mubr.msk.bf16.mxu0 %vm215_vm0, %v72_v51  ;;  %1338 = vmatprep.mubr.msk.bf16.mxu1 %vm215_vm0, %v72_v51 }
  0x41   :  { %290 = vmatmul.mubr.bf16.gmra.mxu0 %v71_v56  ;;  %775 = vmatmul.mubr.bf16.gmra.mxu1 %v71_v56 }
  0x42   :  { %1310 = vmatprep.mubr.msk.bf16.mxu0 %vm215_vm0, %v74_v57  ;;  %1339 = vmatprep.mubr.msk.bf16.mxu1 %vm215_vm0, %v74_v57 }
  0x49   :  { %300 = vmatmul.mubr.bf16.gmra.mxu0 %v73_v62  ;;  %785 = vmatmul.mubr.bf16.gmra.mxu1 %v73_v62 }
  0x4a   :  { %1311 = vmatprep.mubr.msk.bf16.mxu0 %vm215_vm0, %v76_v63  ;;  %1340 = vmatprep.mubr.msk.bf16.mxu1 %vm215_vm0, %v76_v63 }
  0x51   :  { %310 = vmatmul.mubr.bf16.gmra.mxu0 %v75_v4  ;;  %795 = vmatmul.mubr.bf16.gmra.mxu1 %v75_v4 }
  0x52   :  { %1312 = vmatprep.mubr.msk.bf16.mxu0 %vm215_vm0, %v78_v5  ;;  %1341 = vmatprep.mubr.msk.bf16.mxu1 %vm215_vm0, %v78_v5 }
  0x59   :  { %320 = vmatmul.mubr.bf16.gmra.mxu0 %v77_v10  ;;  %805 = vmatmul.mubr.bf16.gmra.mxu1 %v77_v10 }
  0x5a   :  { %1313 = vmatprep.mubr.msk.bf16.mxu0 %vm215_vm0, %v80_v11  ;;  %1342 = vmatprep.mubr.msk.bf16.mxu1 %vm215_vm0, %v80_v11 }
  0x61   :  { %330 = vmatmul.mubr.bf16.gmra.mxu0 %v79_v16  ;;  %815 = vmatmul.mubr.bf16.gmra.mxu1 %v79_v16 }
  0x62   :  { %1314 = vmatprep.mubr.msk.bf16.mxu0 %vm215_vm0, %v82_v17  ;;  %1343 = vmatprep.mubr.msk.bf16.mxu1 %vm215_vm0, %v82_v17 }
  0x69   :  { %340 = vmatmul.mubr.bf16.gmra.mxu0 %v81_v22  ;;  %825 = vmatmul.mubr.bf16.gmra.mxu1 %v81_v22 }
  0x6a   :  { %1315 = vmatprep.mubr.msk.bf16.mxu0 %vm215_vm0, %v84_v23  ;;  %1344 = vmatprep.mubr.msk.bf16.mxu1 %vm215_vm0, %v84_v23 }
  0x71   :  { %350 = vmatmul.mubr.bf16.gmra.mxu0 %v83_v26  ;;  %835 = vmatmul.mubr.bf16.gmra.mxu1 %v83_v26 }
  0xf9   :  { %v281_v37 = vpop.f32.mrf.mxu0  ;;  %v766_v38 = vpop.f32.mrf.mxu1 }
  0xfa   :  { %v282_v39 = vadd.f32 %v281_v37, %v1755_v33  ;;  %v767_v40 = vadd.f32 %v766_v38, %v1758_v34 }
  0xfb   :  { %v283_v41 = vpop.f32.mrf.mxu0  ;;  %v768_v42 = vpop.f32.mrf.mxu1 }
  0xfc   :  { %v360_v43 = vmul.f32 0.5, %v282_v39  ;;  %v845_v44 = vmul.f32 0.5, %v767_v40  ;;  %v284_v45 = vadd.f32 %v283_v41, %v1761_v35  ;;  %v769_v46 = vadd.f32 %v768_v42, %v1764_v36 }
  0xfd   :  { %v285_v47 = vpop.f32.mrf.mxu0  ;;  %v770_v48 = vpop.f32.mrf.mxu1 }
  0xfe   :  { %v361_v49 = vmul.f32 0.5, %v284_v45  ;;  %v846_v50 = vmul.f32 0.5, %v769_v46  ;;  %v286_v51 = vadd.f32 %v285_v47, %v1755_v33  ;;  %1410 = vtanh.f32 %v360_v43  ;;  %v973_v46 = vld [vmem:[%s2203_s3 + $0x2] sm:$0x3]  ;;  %s1595_s3 = smov 1  }
  0xff   :  { %v771_v52 = vadd.f32 %v770_v48, %v1758_v34  ;;  %v287_v53 = vpop.f32.mrf.mxu0  ;;  %v772_v54 = vpop.f32.mrf.mxu1  ;;  %1412 = vtanh.f32 %v845_v44  ;;  %v1791_v45 = vrot.slane %v488_v27, %v1744_v29 }
 0x100   :  { %v362_v55 = vmul.f32 0.5, %v286_v51  ;;  %v288_v56 = vadd.f32 %v287_v53, %v1761_v35  ;;  %1414 = vtanh.f32 %v361_v49  ;;  %v773_v58 = vadd.f32 %v772_v54, %v1764_v36 }
 0x101   :  { %v847_v57 = vmul.f32 0.5, %v771_v52  ;;  %v291_v59 = vpop.f32.mrf.mxu0  ;;  %v776_v60 = vpop.f32.mrf.mxu1  ;;  %1416 = vtanh.f32 %v846_v50  ;;  %v1798_v52 = vrot.slane %v488_v27, %v1752_v32 }
 0x102   :  { %v363_v61 = vmul.f32 0.5, %v288_v56  ;;  %v292_v62 = vadd.f32 %v291_v59, %v1755_v33  ;;  %1418 = vtanh.f32 %v362_v55  ;;  %v777_v63 = vadd.f32 %v776_v60, %v1758_v34 }
 0x103   :  { %v293_v0 = vpop.f32.mrf.mxu0  ;;  %v778_v1 = vpop.f32.mrf.mxu1  ;;  %1420 = vtanh.f32 %v847_v57  ;;  %v848_v5 = vmul.f32 0.5, %v773_v58 }
 0x104   :  { %v364_v2 = vmul.f32 0.5, %v292_v62  ;;  %v294_v3 = vadd.f32 %v293_v0, %v1761_v35  ;;  %v779_v4 = vadd.f32 %v778_v1, %v1764_v36  ;;  %1422 = vtanh.f32 %v363_v61 }
 0x105   :  { %v849_v6 = vmul.f32 0.5, %v777_v63  ;;  %v295_v7 = vpop.f32.mrf.mxu0  ;;  %v780_v8 = vpop.f32.mrf.mxu1  ;;  %v1805_v63 = vrot.slane %v973_v46, %v1744_v29 }
 0x106   :  { %1424 = vtanh.f32 %v364_v2  ;;  %v365_v9 = vmul.f32 0.5, %v294_v3  ;;  %v850_v10 = vmul.f32 0.5, %v779_v4  ;;  %v296_v11 = vadd.f32 %v295_v7, %v1755_v33 }
 0x107   :  { %1426 = vtanh.f32 %v849_v6  ;;  %v781_v12 = vadd.f32 %v780_v8, %v1758_v34  ;;  %v297_v13 = vpop.f32.mrf.mxu0  ;;  %v782_v14 = vpop.f32.mrf.mxu1  ;;  %v1809_v3 = vrot.slane %v973_v46, %v1752_v32 }
 0x108   :  { %1428 = vtanh.f32 %v365_v9  ;;  %v366_v15 = vmul.f32 0.5, %v296_v11  ;;  %v298_v16 = vadd.f32 %v297_v13, %v1761_v35  ;;  %v783_v17 = vadd.f32 %v782_v14, %v1764_v36 }
 0x109   :  { %1430 = vtanh.f32 %v850_v10  ;;  %v851_v18 = vmul.f32 0.5, %v781_v12  ;;  %v301_v19 = vpop.f32.mrf.mxu0  ;;  %v786_v20 = vpop.f32.mrf.mxu1 }
 0x10a   :  { %1432 = vtanh.f32 %v848_v5  ;;  %v367_v21 = vmul.f32 0.5, %v298_v16  ;;  %v852_v22 = vmul.f32 0.5, %v783_v17  ;;  %v302_v23 = vadd.f32 %v301_v19, %v1755_v33 }
 0x10b   :  { %1434 = vtanh.f32 %v366_v15  ;;  %v787_v24 = vadd.f32 %v786_v20, %v1758_v34  ;;  %v303_v25 = vpop.f32.mrf.mxu0  ;;  %v788_v26 = vpop.f32.mrf.mxu1 }
 0x10c   :  { %v1411_v28 = vpop.eup %1410  ;;  %1436 = vtanh.f32 %v851_v18  ;;  %v368_v30 = vmul.f32 0.5, %v302_v23  ;;  %v304_v31 = vadd.f32 %v303_v25, %v1761_v35  ;;  %v789_v37 = vadd.f32 %v788_v26, %v1764_v36 }
 0x10d   :  { %v1413_v38 = vpop.eup %1412  ;;  %1438 = vtanh.f32 %v367_v21  ;;  %v853_v39 = vmul.f32 0.5, %v787_v24  ;;  %v305_v40 = vpop.f32.mrf.mxu0  ;;  %v424_v56 = vmul.f32 0.5, %v1411_v28 }
 0x10e   :  { %v790_v41 = vpop.f32.mrf.mxu1  ;;  %v1415_v42 = vpop.eup %1414  ;;  %1440 = vtanh.f32 %v852_v22  ;;  %v369_v43 = vmul.f32 0.5, %v304_v31  ;;  %v306_v44 = vadd.f32 %v305_v40, %v1755_v33  ;;  %v854_v48 = vmul.f32 0.5, %v789_v37 }
 0x10f   :  { %v1417_v47 = vpop.eup %1416  ;;  %1442 = vtanh.f32 %v368_v30  ;;  %v791_v49 = vadd.f32 %v790_v41, %v1758_v34  ;;  %v307_v50 = vpop.f32.mrf.mxu0  ;;  %v425_v62 = vmul.f32 0.5, %v1415_v42  ;;  %v1811_v5 = vmul.f32 0.5, %v1413_v38 }
 0x110   :  { %v792_v51 = vpop.f32.mrf.mxu1  ;;  %v1419_v53 = vpop.eup %1418  ;;  %1444 = vtanh.f32 %v853_v39  ;;  %v370_v54 = vmul.f32 0.5, %v306_v44  ;;  %v308_v55 = vadd.f32 %v307_v50, %v1761_v35  ;;  %v1814_v29 = vmul.f32 0.5, %v1417_v47 }
 0x111   :  { %v1801_v57 = vpop.eup %1420  ;;  %v855_v58 = vmul.f32 0.5, %v791_v49  ;;  %v793_v59 = vadd.f32 %v792_v51, %v1764_v36  ;;  %v311_v60 = vpop.f32.mrf.mxu0  ;;  %1446 = vtanh.f32 %v369_v43  ;;  %v456_v12 = vadd.f32 0.5, %v424_v56 }
 0x112   :  { %v796_v61 = vpop.f32.mrf.mxu1  ;;  %v1423_v0 = vpop.eup %1422  ;;  %v371_v1 = vmul.f32 0.5, %v308_v55  ;;  %v312_v2 = vadd.f32 %v311_v60, %v1755_v33  ;;  %1448 = vtanh.f32 %v854_v48  ;;  %v457_v17 = vadd.f32 0.5, %v425_v62 }
 0x113   :  { %v1425_v4 = vpop.eup %1424  ;;  %v856_v6 = vmul.f32 0.5, %v793_v59  ;;  %v797_v7 = vadd.f32 %v796_v61, %v1758_v34  ;;  %v313_v8 = vpop.f32.mrf.mxu0  ;;  %1450 = vtanh.f32 %v370_v54  ;;  %v1818_v19 = vmul.f32 0.5, %v1419_v53 }
 0x114   :  { %v798_v9 = vpop.f32.mrf.mxu1  ;;  %v1427_v10 = vpop.eup %1426  ;;  %v314_v11 = vadd.f32 %v313_v8, %v1761_v35  ;;  %1452 = vtanh.f32 %v855_v58  ;;  %v372_v32 = vmul.f32 0.5, %v312_v2  ;;  %v1821_v23 = vmul.f32 0.5, %v1423_v0 }
 0x115   :  { %v1429_v13 = vpop.eup %1428  ;;  %v799_v14 = vadd.f32 %v798_v9, %v1764_v36  ;;  %v315_v15 = vpop.f32.mrf.mxu0  ;;  %1454 = vtanh.f32 %v371_v1  ;;  %v857_v20 = vmul.f32 0.5, %v797_v7  ;;  %v1824_v30 = vmul.f32 0.5, %v1425_v4 }
 0x116   :  { %v800_v16 = vpop.f32.mrf.mxu1  ;;  %v1431_v18 = vpop.eup %1430  ;;  %v316_v21 = vadd.f32 %v315_v15, %v1755_v33  ;;  %1456 = vtanh.f32 %v856_v6  ;;  %v373_v24 = vmul.f32 0.5, %v314_v11  ;;  %v1826_v31 = vmul.f32 0.5, %v1427_v10 }
 0x117   :  { %v1433_v22 = vpop.eup %1432  ;;  %v801_v25 = vadd.f32 %v800_v16, %v1758_v34  ;;  %v317_v26 = vpop.f32.mrf.mxu0  ;;  %v1828_v37 = vmul.f32 0.5, %v1429_v13  ;;  %v858_v38 = vmul.f32 0.5, %v799_v14  ;;  %v1830_v40 = vmul.f32 0.5, %v1431_v18 }
 0x118   :  { %v802_v27 = vpop.f32.mrf.mxu1  ;;  %v1435_v28 = vpop.eup %1434  ;;  %1458 = vtanh.f32 %v372_v32  ;;  %v500_v41 = vmul.f32 %v1791_v45, %v456_v12  ;;  %v501_v42 = vmul.f32 %v1798_v52, %v457_v17  ;;  %v374_v47 = vmul.f32 0.5, %v316_v21 }
 0x119   :  { %v1437_v39 = vpop.eup %1436  ;;  %v321_v43 = vpop.f32.mrf.mxu0  ;;  %1460 = vtanh.f32 %v857_v20  ;;  %v318_v48 = vadd.f32 %v317_v26, %v1761_v35  ;;  %v803_v49 = vadd.f32 %v802_v27, %v1764_v36  ;;  %v859_v51 = vmul.f32 0.5, %v801_v25 }
 0x11a   :  { %v806_v44 = vpop.f32.mrf.mxu1  ;;  %v1439_v46 = vpop.eup %1438  ;;  %1462 = vtanh.f32 %v373_v24  ;;  %v532_v53 = vadd.f32 %v501_v42, %v500_v41  ;;  %v322_v54 = vadd.f32 %v321_v43, %v1755_v33  ;;  %v1837_v59 = vmul.f32 0.5, %v1435_v28 }
 0x11b   :  { %v1441_v50 = vpop.eup %1440  ;;  %v323_v55 = vpop.f32.mrf.mxu0  ;;  %v1839_v60 = vmul.f32 0.5, %v1437_v39  ;;  %1464 = vtanh.f32 %v858_v38  ;;  %v375_v61 = vmul.f32 0.5, %v318_v48  ;;  %v860_v0 = vmul.f32 0.5, %v803_v49 }
 0x11c   :  { %v808_v56 = vpop.f32.mrf.mxu1  ;;  %v1443_v58 = vpop.eup %1442  ;;  %533 = vadd.xlane.f32.xlu0 %v532_v53  ;;  %v807_v1 = vadd.f32 %v806_v44, %v1758_v34  ;;  %v911_v2 = vmul.f32 0.5, %v1801_v57  ;;  %v912_v4 = vmul.f32 0.5, %v1433_v22  ;;  %v1843_v8 = vmul.f32 0.5, %v1439_v46 }
 0x11d   :  { %v1445_v62 = vpop.eup %1444  ;;  %v325_v6 = vpop.f32.mrf.mxu0  ;;  %v1845_v9 = vmul.f32 0.5, %v1441_v50  ;;  %1466 = vtanh.f32 %v374_v47  ;;  %v941_v10 = vadd.f32 0.5, %v1811_v5  ;;  %v376_v12 = vmul.f32 0.5, %v322_v54 }
 0x11e   :  { %v810_v7 = vpop.f32.mrf.mxu1  ;;  %v1447_v11 = vpop.eup %1446  ;;  %1468 = vtanh.f32 %v859_v51  ;;  %v943_v13 = vadd.f32 0.5, %v911_v2  ;;  %v944_v32 = vadd.f32 0.5, %v912_v4  ;;  %v1848_v17 = vmul.f32 0.5, %v1443_v58 }
 0x11f   :  { %v327_v14 = vpop.f32.mrf.mxu0  ;;  %v1449_v16 = vpop.eup %1448  ;;  %v1850_v57 = vmul.f32 0.5, %v1445_v62  ;;  %1470 = vtanh.f32 %v375_v61  ;;  %v942_v18 = vadd.f32 0.5, %v1814_v29  ;;  %v861_v21 = vmul.f32 0.5, %v807_v1 }
 0x120   :  { %v812_v15 = vpop.f32.mrf.mxu1  ;;  %v1451_v20 = vpop.eup %1450  ;;  %1472 = vtanh.f32 %v860_v0  ;;  %v987_v5 = vmul.f32 %v1805_v63, %v943_v13  ;;  %v988_v22 = vmul.f32 %v1809_v3, %v944_v32  ;;  %v985_v27 = vmul.f32 %v1805_v63, %v941_v10 }
 0x121   :  { %v331_v24 = vpop.f32.mrf.mxu0  ;;  %v1453_v26 = vpop.eup %1452  ;;  %v986_v28 = vmul.f32 %v1809_v3, %v942_v18  ;;  %v324_v38 = vadd.f32 %v323_v55, %v1761_v35  ;;  %v809_v39 = vadd.f32 %v808_v56, %v1764_v36  ;;  %v1859_v29 = vmul.f32 0.5, %v1447_v11 }
 0x122   :  { %v816_v25 = vpop.f32.mrf.mxu1  ;;  %v1455_v41 = vpop.eup %1454  ;;  %1474 = vtanh.f32 %v376_v12  ;;  %v1020_v42 = vadd.f32 %v988_v22, %v987_v5  ;;  %v326_v43 = vadd.f32 %v325_v6, %v1755_v33  ;;  %v811_v49 = vadd.f32 %v810_v7, %v1758_v34 }
 0x123   :  { %v1457_v44 = vpop.eup %1456  ;;  %v1017_v46 = vadd.f32 %v986_v28, %v985_v27  ;;  %v377_v47 = vmul.f32 0.5, %v324_v38  ;;  %v862_v48 = vmul.f32 0.5, %v809_v39  ;;  %v333_v50 = vpop.f32.mrf.mxu0  ;;  %v1863_v51 = vmul.f32 0.5, %v1449_v16 }
 0x124   :  { %1476 = vtanh.f32 %v861_v21  ;;  %1021 = vadd.xlane.f32.xlu1 %v1020_v42  ;;  %v378_v53 = vmul.f32 0.5, %v326_v43  ;;  %v460_v54 = vadd.f32 0.5, %v1824_v30  ;;  %v818_v55 = vpop.f32.mrf.mxu1  ;;  %v1866_v58 = vmul.f32 0.5, %v1451_v20 }
 0x125   :  { %v1459_v56 = vpop.eup %1458  ;;  %v1868_v61 = vmul.f32 0.5, %v1453_v26  ;;  %1018 = vadd.xlane.f32.xlu0 %v1017_v46  ;;  %v461_v62 = vadd.f32 0.5, %v1828_v37  ;;  %v458_v0 = vadd.f32 0.5, %v1818_v19  ;;  %v1872_v2 = vmul.f32 0.5, %v1455_v41  ;;  %v335_v12 = vpop.f32.mrf.mxu0 }
 0x126   :  { %v1461_v1 = vpop.eup %1460  ;;  %v1874_v4 = vmul.f32 0.5, %v1457_v44  ;;  %1478 = vtanh.f32 %v377_v47  ;;  %v459_v6 = vadd.f32 0.5, %v1821_v23  ;;  %v863_v7 = vmul.f32 0.5, %v811_v49  ;;  %v820_v16 = vpop.f32.mrf.mxu1 }
 0x127   :  { %v1463_v30 = vpop.eup %1462  ;;  %1480 = vtanh.f32 %v862_v48  ;;  %v504_v10 = vmul.f32 %v1791_v45, %v460_v54  ;;  %v505_v11 = vmul.f32 %v1798_v52, %v461_v62  ;;  %v502_v19 = vmul.f32 %v1791_v45, %v458_v0 }
 0x128   :  { %v1465_v13 = vpop.eup %1464  ;;  %1482 = vtanh.f32 %v378_v53  ;;  %v503_v37 = vmul.f32 %v1798_v52, %v459_v6  ;;  %v328_v32 = vadd.f32 %v327_v14, %v1761_v35  ;;  %v813_v23 = vadd.f32 %v812_v15, %v1764_v36  ;;  %v337_v15 = vpop.f32.mrf.mxu0 }
 0x129   :  { %v538_v18 = vadd.f32 %v505_v11, %v504_v10  ;;  %v332_v20 = vadd.f32 %v331_v24, %v1755_v33  ;;  %v817_v21 = vadd.f32 %v816_v25, %v1758_v34  ;;  %v462_v27 = vadd.f32 0.5, %v1837_v59  ;;  %v822_v44 = vpop.f32.mrf.mxu1 }
 0x12a   :  { %v1467_v5 = vpop.eup %1466  ;;  %v535_v22 = vadd.f32 %v503_v37, %v502_v19  ;;  %v379_v26 = vmul.f32 0.5, %v328_v32  ;;  %v463_v28 = vadd.f32 0.5, %v1843_v8  ;;  %v1887_v39 = vmul.f32 0.5, %v1459_v56 }
 0x12b   :  { %v1469_v38 = vpop.eup %1468  ;;  %v1889_v41 = vmul.f32 0.5, %v1461_v1  ;;  %1484 = vtanh.f32 %v863_v7  ;;  %539 = vadd.xlane.f32.xlu1 %v538_v18  ;;  %v864_v14 = vmul.f32 0.5, %v813_v23  ;;  %v1891_v24 = vmul.f32 0.5, %v1463_v30  ;;  %v341_v30 = vpop.f32.mrf.mxu0 }
 0x12c   :  { %v1471_v42 = vpop.eup %1470  ;;  %536 = vadd.xlane.f32.xlu0 %v535_v22  ;;  %v380_v25 = vmul.f32 0.5, %v332_v20  ;;  %v506_v43 = vmul.f32 %v1791_v45, %v462_v27  ;;  %v507_v59 = vmul.f32 %v1798_v52, %v463_v28  ;;  %v1895_v46 = vmul.f32 0.5, %v1465_v13  ;;  %v826_v10 = vpop.f32.mrf.mxu1 }
 0x12d   :  { %v1473_v8 = vpop.eup %1472  ;;  %1486 = vtanh.f32 %v379_v26  ;;  %v945_v47 = vadd.f32 0.5, %v1826_v31  ;;  %v946_v48 = vadd.f32 0.5, %v1830_v40  ;;  %v1899_v49 = vmul.f32 0.5, %v1467_v5  ;;  %v343_v5 = vpop.f32.mrf.mxu0 }
 0x12e   :  { %v865_v53 = vmul.f32 0.5, %v817_v21  ;;  %v541_v54 = vadd.f32 %v507_v59, %v506_v43  ;;  %v334_v56 = vadd.f32 %v333_v50, %v1761_v35  ;;  %1488 = vtanh.f32 %v864_v14  ;;  %v828_v27 = vpop.f32.mrf.mxu1 }
 0x12f   :  { %v1475_v62 = vpop.eup %1474  ;;  %v989_v0 = vmul.f32 %v1805_v63, %v945_v47  ;;  %v990_v1 = vmul.f32 %v1809_v3, %v946_v48  ;;  %v819_v6 = vadd.f32 %v818_v55, %v1764_v36  ;;  %v1905_v7 = vmul.f32 0.5, %v1469_v38  ;;  %v345_v48 = vpop.f32.mrf.mxu0 }
 0x130   :  { %1490 = vtanh.f32 %v380_v25  ;;  %542 = vadd.xlane.f32.xlu1 %v541_v54  ;;  %v381_v31 = vmul.f32 0.5, %v334_v56  ;;  %v947_v40 = vadd.f32 0.5, %v1839_v60  ;;  %v336_v50 = vadd.f32 %v335_v12, %v1755_v33 }
 0x131   :  { %v1477_v11 = vpop.eup %1476  ;;  %v1023_v13 = vadd.f32 %v990_v1, %v989_v0  ;;  %v948_v19 = vadd.f32 0.5, %v1845_v9  ;;  %v464_v37 = vadd.f32 0.5, %v1848_v17  ;;  %v1911_v32 = vmul.f32 0.5, %v1471_v42  ;;  %v830_v1 = vpop.f32.mrf.mxu1 }
 0x132   :  { %v1913_v55 = vmul.f32 0.5, %v1473_v8  ;;  %v866_v18 = vmul.f32 0.5, %v819_v6  ;;  %v821_v23 = vadd.f32 %v820_v16, %v1758_v34  ;;  %1492 = vtanh.f32 %v865_v53 }
 0x133   :  { %v1479_v20 = vpop.eup %1478  ;;  %1024 = vadd.xlane.f32.xlu0 %v1023_v13  ;;  %v991_v60 = vmul.f32 %v1805_v63, %v947_v40  ;;  %v992_v21 = vmul.f32 %v1809_v3, %v948_v19  ;;  %v465_v12 = vadd.f32 0.5, %v1859_v29  ;;  %v1919_v22 = vmul.f32 0.5, %v1475_v62 }
 0x134   :  { %v1481_v9 = vpop.eup %1480  ;;  %v1921_v17 = vmul.f32 0.5, %v1477_v11  ;;  %1494 = vtanh.f32 %v381_v31  ;;  %v338_v26 = vadd.f32 %v337_v15, %v1761_v35  ;;  %v382_v28 = vmul.f32 0.5, %v336_v50  ;;  %v347_v50 = vpop.f32.mrf.mxu0 }
 0x135   :  { %v1483_v16 = vpop.eup %1482  ;;  %v1026_v38 = vadd.f32 %v992_v21, %v991_v60  ;;  %v508_v14 = vmul.f32 %v1791_v45, %v464_v37  ;;  %v509_v42 = vmul.f32 %v1798_v52, %v465_v12  ;;  %v1926_v25 = vmul.f32 0.5, %v1479_v20 }
 0x136   :  { %1496 = vtanh.f32 %v866_v18  ;;  %v867_v29 = vmul.f32 0.5, %v821_v23  ;;  %v823_v43 = vadd.f32 %v822_v44, %v1764_v36  ;;  %v1929_v59 = vmul.f32 0.5, %v1481_v9  ;;  %v832_v23 = vpop.f32.mrf.mxu1 }
 0x137   :  { %1027 = vadd.xlane.f32.xlu1 %v1026_v38  ;;  %v544_v8 = vadd.f32 %v509_v42, %v508_v14  ;;  %v466_v15 = vadd.f32 0.5, %v1866_v58  ;;  %v467_v47 = vadd.f32 0.5, %v1872_v2  ;;  %v383_v54 = vmul.f32 0.5, %v338_v26  ;;  %v351_v42 = vpop.f32.mrf.mxu0 }
 0x138   :  { %v1485_v53 = vpop.eup %1484  ;;  %v342_v56 = vadd.f32 %v341_v30, %v1755_v33  ;;  %v827_v62 = vadd.f32 %v826_v10, %v1758_v34  ;;  %v949_v0 = vadd.f32 0.5, %v1850_v57  ;;  %v868_v44 = vmul.f32 0.5, %v823_v43 }
 0x139   :  { %545 = vadd.xlane.f32.xlu0 %v544_v8  ;;  %v510_v6 = vmul.f32 %v1791_v45, %v466_v15  ;;  %v511_v31 = vmul.f32 %v1798_v52, %v467_v47  ;;  %v950_v58 = vadd.f32 0.5, %v1863_v51  ;;  %v1939_v2 = vmul.f32 0.5, %v1483_v16  ;;  %v836_v47 = vpop.f32.mrf.mxu1 }
 0x13a   :  { %v1487_v40 = vpop.eup %1486  ;;  %1498 = vtanh.f32 %v382_v28  ;;  %v993_v11 = vmul.f32 %v1805_v63, %v949_v0  ;;  %v344_v30 = vadd.f32 %v343_v5, %v1761_v35  ;;  %v1943_v10 = vmul.f32 0.5, %v1485_v53 }
 0x13b   :  { %1500 = vtanh.f32 %v867_v29  ;;  %v547_v57 = vadd.f32 %v511_v31, %v510_v6  ;;  %v994_v13 = vmul.f32 %v1809_v3, %v950_v58  ;;  %v1489_v19 = vpop.eup %1488  ;;  %v384_v37 = vmul.f32 0.5, %v342_v56 }
 0x13c   :  { %1502 = vtanh.f32 %v383_v54  ;;  %v869_v18 = vmul.f32 0.5, %v827_v62  ;;  %v829_v51 = vadd.f32 %v828_v27, %v1764_v36  ;;  %v1947_v60 = vmul.f32 0.5, %v1487_v40  ;;  %v838_v40 = vpop.f32.mrf.mxu1 }
 0x13d   :  { %v1491_v20 = vpop.eup %1490  ;;  %1504 = vtanh.f32 %v868_v44  ;;  %548 = vadd.xlane.f32.xlu1 %v547_v57  ;;  %v1029_v21 = vadd.f32 %v994_v13, %v993_v11  ;;  %v346_v12 = vadd.f32 %v345_v48, %v1755_v33  ;;  %v385_v5 = vmul.f32 0.5, %v344_v30  ;;  %v353_v44 = vpop.f32.mrf.mxu0 }
 0x13e   :  { %v831_v9 = vadd.f32 %v830_v1, %v1758_v34  ;;  %v951_v26 = vadd.f32 0.5, %v1868_v61  ;;  %v952_v16 = vadd.f32 0.5, %v1874_v4  ;;  %v1953_v28 = vmul.f32 0.5, %v1489_v19 }
 0x13f   :  { %1030 = vadd.xlane.f32.xlu0 %v1029_v21  ;;  %v870_v27 = vmul.f32 0.5, %v829_v51  ;;  %v468_v38 = vadd.f32 0.5, %v1887_v39  ;;  %v469_v14 = vadd.f32 0.5, %v1891_v24  ;;  %v1493_v29 = vpop.eup %1492  ;;  %1506 = vtanh.f32 %v384_v37 }
 0x140   :  { %v386_v43 = vmul.f32 0.5, %v346_v12  ;;  %v995_v8 = vmul.f32 %v1805_v63, %v951_v26  ;;  %v996_v15 = vmul.f32 %v1809_v3, %v952_v16  ;;  %v1959_v48 = vmul.f32 0.5, %v1491_v20  ;;  %v355_v20 = vpop.f32.mrf.mxu0 }
 0x141   :  { %v1495_v61 = vpop.eup %1494  ;;  %1508 = vtanh.f32 %v869_v18  ;;  %v512_v4 = vmul.f32 %v1791_v45, %v468_v38  ;;  %v513_v53 = vmul.f32 %v1798_v52, %v469_v14  ;;  %v871_v39 = vmul.f32 0.5, %v831_v9 }
 0x142   :  { %1510 = vtanh.f32 %v385_v5  ;;  %v1032_v24 = vadd.f32 %v996_v15, %v995_v8  ;;  %v348_v54 = vadd.f32 %v347_v50, %v1761_v35  ;;  %v833_v0 = vadd.f32 %v832_v23, %v1764_v36  ;;  %v840_v5 = vpop.f32.mrf.mxu1 }
 0x143   :  { %v1497_v56 = vpop.eup %1496  ;;  %1512 = vtanh.f32 %v870_v27  ;;  %v550_v62 = vadd.f32 %v513_v53, %v512_v4  ;;  %v352_v1 = vadd.f32 %v351_v42, %v1755_v33  ;;  %v470_v31 = vadd.f32 0.5, %v1899_v49 }
 0x144   :  { %1514 = vtanh.f32 %v386_v43  ;;  %1033 = vadd.xlane.f32.xlu1 %v1032_v24  ;;  %v387_v6 = vmul.f32 0.5, %v348_v54  ;;  %v471_v58 = vadd.f32 0.5, %v1911_v32  ;;  %v872_v11 = vmul.f32 0.5, %v833_v0 }
 0x145   :  { %551 = vadd.xlane.f32.xlu0 %v550_v62  ;;  %v837_v30 = vadd.f32 %v836_v47, %v1758_v34  ;;  %v953_v57 = vadd.f32 0.5, %v1889_v41  ;;  %v954_v13 = vadd.f32 0.5, %v1895_v46  ;;  %v1971_v50 = vmul.f32 0.5, %v1493_v29  ;;  %v842_v62 = vpop.f32.mrf.mxu1 }
 0x146   :  { %v1973_v19 = vmul.f32 0.5, %v1495_v61  ;;  %1516 = vtanh.f32 %v871_v39  ;;  %v388_v37 = vmul.f32 0.5, %v352_v1  ;;  %v514_v49 = vmul.f32 %v1791_v45, %v470_v31  ;;  %v357_v39 = vpop.f32.mrf.mxu0 }
 0x147   :  { %v1499_v18 = vpop.eup %1498  ;;  %v515_v32 = vmul.f32 %v1798_v52, %v471_v58  ;;  %v997_v51 = vmul.f32 %v1805_v63, %v953_v57  ;;  %v998_v23 = vmul.f32 %v1809_v3, %v954_v13  ;;  %v1979_v41 = vmul.f32 0.5, %v1497_v56 }
 0x148   :  { %v1501_v21 = vpop.eup %1500  ;;  %1518 = vtanh.f32 %v387_v6  ;;  %v354_v46 = vadd.f32 %v353_v44, %v1761_v35  ;;  %v839_v12 = vadd.f32 %v838_v40, %v1764_v36  ;;  %v873_v26 = vmul.f32 0.5, %v837_v30 }
 0x149   :  { %v1503_v9 = vpop.eup %1502  ;;  %1520 = vtanh.f32 %v872_v11  ;;  %v553_v16 = vadd.f32 %v515_v32, %v514_v49  ;;  %v1035_v27 = vadd.f32 %v998_v23, %v997_v51  ;;  %v356_v29 = vadd.f32 %v355_v20, %v1755_v33 }
 0x14a   :  { %v1505_v38 = vpop.eup %1504  ;;  %1522 = vtanh.f32 %v388_v37  ;;  %v389_v14 = vmul.f32 0.5, %v354_v46  ;;  %v874_v42 = vmul.f32 0.5, %v839_v12  ;;  %v841_v43 = vadd.f32 %v840_v5, %v1758_v34 }
 0x14b   :  { %554 = vadd.xlane.f32.xlu1 %v553_v16  ;;  %1036 = vadd.xlane.f32.xlu0 %v1035_v27  ;;  %v955_v8 = vadd.f32 0.5, %v1905_v7  ;;  %v956_v15 = vadd.f32 0.5, %v1913_v55  ;;  %v472_v47 = vadd.f32 0.5, %v1919_v22  ;;  %v446_v61 = vmul.f32 0.5, %v1499_v18 }
 0x14c   :  { %1524 = vtanh.f32 %v389_v14  ;;  %v390_v4 = vmul.f32 0.5, %v356_v29  ;;  %v473_v53 = vadd.f32 0.5, %v1926_v25  ;;  %v1507_v24 = vpop.eup %1506  ;;  %v1989_v54 = vmul.f32 0.5, %v1501_v21 }
 0x14d   :  { %v447_v33 = vmul.f32 0.5, %v1503_v9  ;;  %v999_v56 = vmul.f32 %v1805_v63, %v955_v8  ;;  %v1000_v34 = vmul.f32 %v1809_v3, %v956_v15  ;;  %v932_v0 = vmul.f32 0.5, %v1505_v38 }
 0x14e   :  { %v1509_v7 = vpop.eup %1508  ;;  %1526 = vtanh.f32 %v873_v26  ;;  %v516_v55 = vmul.f32 %v1791_v45, %v472_v47  ;;  %v517_v22 = vmul.f32 %v1798_v52, %v473_v53  ;;  %v875_v25 = vmul.f32 0.5, %v841_v43 }
 0x14f   :  { %v1511_v1 = vpop.eup %1510  ;;  %1528 = vtanh.f32 %v874_v42  ;;  %v1038_v44 = vadd.f32 %v1000_v34, %v999_v56  ;;  %v358_v6 = vadd.f32 %v357_v39, %v1761_v35  ;;  %v843_v40 = vadd.f32 %v842_v62, %v1764_v36 }
 0x150   :  { %v1513_v31 = vpop.eup %1512  ;;  %1530 = vtanh.f32 %v390_v4  ;;  %v556_v58 = vadd.f32 %v517_v22, %v516_v55  ;;  %v474_v11 = vadd.f32 0.5, %v1939_v2  ;;  %v475_v13 = vadd.f32 0.5, %v1947_v60 }
 0x151   :  { %v1515_v30 = vpop.eup %1514  ;;  %1039 = vadd.xlane.f32.xlu1 %v1038_v44  ;;  %v391_v57 = vmul.f32 0.5, %v358_v6  ;;  %v957_v37 = vadd.f32 0.5, %v1921_v17  ;;  %v958_v18 = vadd.f32 0.5, %v1929_v59  ;;  %v876_v49 = vmul.f32 0.5, %v843_v40 }
 0x152   :  { %557 = vadd.xlane.f32.xlu0 %v556_v58  ;;  %v518_v35 = vmul.f32 %v1791_v45, %v474_v11  ;;  %v959_v32 = vadd.f32 0.5, %v1943_v10  ;;  %v960_v51 = vadd.f32 0.5, %v1953_v28  ;;  %v519_v2 = vmul.f32 %v1798_v52, %v475_v13 }
 0x153   :  { %v1517_v36 = vpop.eup %1516  ;;  %1532 = vtanh.f32 %v391_v57  ;;  %v1001_v23 = vmul.f32 %v1805_v63, %v957_v37  ;;  %v1002_v60 = vmul.f32 %v1809_v3, %v958_v18  ;;  %v448_v20 = vmul.f32 0.5, %v1507_v24 }
 0x154   :  { %v933_v17 = vmul.f32 0.5, %v1509_v7  ;;  %v449_v21 = vmul.f32 0.5, %v1511_v1  ;;  %1534 = vtanh.f32 %v876_v49  ;;  %v559_v46 = vadd.f32 %v519_v2, %v518_v35 }
 0x155   :  { %v1519_v59 = vpop.eup %1518  ;;  %v1041_v12 = vadd.f32 %v1002_v60, %v1001_v23  ;;  %v1004_v5 = vmul.f32 %v1809_v3, %v960_v51  ;;  %v476_v10 = vadd.f32 0.5, %v1959_v48  ;;  %v934_v9 = vmul.f32 0.5, %v1513_v31 }
 0x156   :  { %v1521_v28 = vpop.eup %1520  ;;  %v450_v26 = vmul.f32 0.5, %v1515_v30  ;;  %v477_v16 = vadd.f32 0.5, %v1973_v19  ;;  %v478_v27 = vadd.f32 0.5, %v446_v61  ;;  %1536 = vtanh.f32 %v875_v25  ;;  %560 = vadd.xlane.f32.xlu1 %v559_v46 }
 0x157   :  { %v1523_v38 = vpop.eup %1522  ;;  %1042 = vadd.xlane.f32.xlu0 %v1041_v12  ;;  %v1003_v14 = vmul.f32 %v1805_v63, %v959_v32  ;;  %v479_v42 = vadd.f32 0.5, %v447_v33  ;;  %v961_v29 = vadd.f32 0.5, %v1971_v50  ;;  %v451_v43 = vmul.f32 0.5, %v1519_v59 }
 0x158   :  { %v520_v8 = vmul.f32 %v1791_v45, %v476_v10  ;;  %v521_v48 = vmul.f32 %v1798_v52, %v477_v16  ;;  %v962_v15 = vadd.f32 0.5, %v1979_v41  ;;  %v522_v19 = vmul.f32 %v1791_v45, %v478_v27 }
 0x159   :  { %v1525_v47 = vpop.eup %1524  ;;  %v1044_v4 = vadd.f32 %v1004_v5, %v1003_v14  ;;  %v523_v61 = vmul.f32 %v1798_v52, %v479_v42  ;;  %v964_v53 = vadd.f32 0.5, %v932_v0  ;;  %v1005_v24 = vmul.f32 %v1805_v63, %v961_v29 }
 0x15a   :  { %v562_v39 = vadd.f32 %v521_v48, %v520_v8  ;;  %v1006_v33 = vmul.f32 %v1809_v3, %v962_v15  ;;  %v480_v50 = vadd.f32 0.5, %v448_v20  ;;  %v963_v62 = vadd.f32 0.5, %v1989_v54 }
 0x15b   :  { %v1527_v56 = vpop.eup %1526  ;;  %1045 = vadd.xlane.f32.xlu1 %v1044_v4  ;;  %v565_v34 = vadd.f32 %v523_v61, %v522_v19  ;;  %v481_v7 = vadd.f32 0.5, %v449_v21  ;;  %v936_v55 = vmul.f32 0.5, %v1521_v28  ;;  %v452_v22 = vmul.f32 0.5, %v1523_v38 }
 0x15c   :  { %v1529_v41 = vpop.eup %1528  ;;  %v453_v1 = vmul.f32 0.5, %v1525_v47  ;;  %563 = vadd.xlane.f32.xlu0 %v562_v39  ;;  %v1008_v0 = vmul.f32 %v1809_v3, %v964_v53  ;;  %v482_v6 = vadd.f32 0.5, %v450_v26  ;;  %v483_v31 = vadd.f32 0.5, %v451_v43 }
 0x15d   :  { %v1531_v25 = vpop.eup %1530  ;;  %v525_v44 = vmul.f32 %v1798_v52, %v481_v7  ;;  %v1047_v58 = vadd.f32 %v1006_v33, %v1005_v24  ;;  %v524_v40 = vmul.f32 %v1791_v45, %v480_v50  ;;  %v965_v11 = vadd.f32 0.5, %v933_v17 }
 0x15e   :  { %v966_v30 = vadd.f32 0.5, %v934_v9  ;;  %v935_v57 = vmul.f32 0.5, %v1517_v36  ;;  %v1007_v54 = vmul.f32 %v1805_v63, %v963_v62  ;;  %v527_v13 = vmul.f32 %v1798_v52, %v483_v31 }
 0x15f   :  { %566 = vadd.xlane.f32.xlu1 %v565_v34  ;;  %v937_v18 = vmul.f32 0.5, %v1527_v56  ;;  %v454_v49 = vmul.f32 0.5, %v1531_v25  ;;  %v568_v35 = vadd.f32 %v525_v44, %v524_v40  ;;  %v485_v32 = vadd.f32 0.5, %v453_v1  ;;  %v2038_v34 = vld [vmem:[#allocation2] ss:$0 sm:$0xff] }
 0x160   :  { %v1533_v37 = vpop.eup %1532  ;;  %1048 = vadd.xlane.f32.xlu0 %v1047_v58  ;;  %v1050_v23 = vadd.f32 %v1008_v0, %v1007_v54  ;;  %v526_v60 = vmul.f32 %v1791_v45, %v482_v6  ;;  %v968_v20 = vadd.f32 0.5, %v936_v55  ;;  %v938_v17 = vmul.f32 0.5, %v1529_v41 }
 0x161   :  { %v1535_v51 = vpop.eup %1534  ;;  %v455_v2 = vmul.f32 0.5, %v1533_v37  ;;  %v1009_v36 = vmul.f32 %v1805_v63, %v965_v11  ;;  %v1010_v21 = vmul.f32 %v1809_v3, %v966_v30  ;;  %v484_v59 = vadd.f32 0.5, %v452_v22 }
 0x162   :  { %v571_v46 = vadd.f32 %v527_v13, %v526_v60  ;;  %v967_v12 = vadd.f32 0.5, %v935_v57  ;;  %v529_v28 = vmul.f32 %v1798_v52, %v485_v32  ;;  %v940_v9 = vmul.f32 0.5, %v1535_v51 }
 0x163   :  { %1051 = vadd.xlane.f32.xlu1 %v1050_v23  ;;  %v487_v5 = vadd.f32 0.5, %v455_v2  ;;  %v1537_v10 = vpop.eup %1536  ;;  %v1012_v26 = vmul.f32 %v1809_v3, %v968_v20  ;;  %v486_v16 = vadd.f32 0.5, %v454_v49  ;;  %v1053_v27 = vadd.f32 %v1010_v21, %v1009_v36 }
 0x164   :  { %569 = vadd.xlane.f32.xlu0 %v568_v35  ;;  %v528_v38 = vmul.f32 %v1791_v45, %v484_v59  ;;  %v969_v14 = vadd.f32 0.5, %v937_v18  ;;  %v970_v42 = vadd.f32 0.5, %v938_v17  ;;  %v939_v29 = vmul.f32 0.5, %v1537_v10 }
 0x165   :  { %v1011_v43 = vmul.f32 %v1805_v63, %v967_v12  ;;  %v531_v8 = vmul.f32 %v1798_v52, %v487_v5  ;;  %v530_v47 = vmul.f32 %v1791_v45, %v486_v16  ;;  %v972_v4 = vadd.f32 0.5, %v940_v9 }
 0x166   :  { %v574_v48 = vadd.f32 %v529_v28, %v528_v38  ;;  %v1013_v19 = vmul.f32 %v1805_v63, %v969_v14  ;;  %v1014_v61 = vmul.f32 %v1809_v3, %v970_v42  ;;  %v971_v39 = vadd.f32 0.5, %v939_v29 }
 0x167   :  { %572 = vadd.xlane.f32.xlu1 %v571_v46  ;;  %v1056_v15 = vadd.f32 %v1012_v26, %v1011_v43  ;;  %v577_v53 = vadd.f32 %v531_v8, %v530_v47  ;;  %v1016_v24 = vmul.f32 %v1809_v3, %v972_v4 }
 0x168   :  { %1054 = vadd.xlane.f32.xlu0 %v1053_v27  ;;  %v1059_v33 = vadd.f32 %v1014_v61, %v1013_v19  ;;  %v1015_v52 = vmul.f32 %v1805_v63, %v971_v39 }
 0x16a   :  { %v1062_v50 = vadd.f32 %v1016_v24, %v1015_v52 }
 0x16b   :  { %1057 = vadd.xlane.f32.xlu1 %v1056_v15 }
 0x16c   :  { %575 = vadd.xlane.f32.xlu0 %v574_v48 }
 0x16f   :  { %578 = vadd.xlane.f32.xlu1 %v577_v53 }
 0x170   :  { %1060 = vadd.xlane.f32.xlu0 %v1059_v33 }
 0x173   :  { %1063 = vadd.xlane.f32.xlu1 %v1062_v50 }
 0x1a5   :  { %v534_v56 = vpop.xlane.xlu0 %533 }
 0x1ad   :  { %v1022_v45 = vpop.xlane.xlu1 %1021 }
 0x1ae   :  { %v1019_v62 = vpop.xlane.xlu0 %1018 }
 0x1af   :  { %v1065_v7 = vadd.f32 %v1019_v62, %v534_v56 }
 0x1b1   :  { %v1088_v41 = vadd.f32 %v2038_v34, %v1065_v7 }
 0x1b3   :  { %v1104_v55 = vmul.f32 0.5, %v1088_v41 }
 0x1b4   :  { %v540_v22 = vpop.xlane.xlu1 %539 }
 0x1b5   :  { %1538 = vtanh.f32 %v1104_v55  ;;  %v537_v1 = vpop.xlane.xlu0 %536 }
 0x1b6   :  { %v1066_v3 = vadd.f32 %v1022_v45, %v537_v1 }
 0x1b8   :  { %v1089_v25 = vadd.f32 %v2038_v34, %v1066_v3 }
 0x1b9   :  { %v543_v63 = vpop.xlane.xlu1 %542 }
 0x1ba   :  { %v1105_v0 = vmul.f32 0.5, %v1089_v25 }
 0x1bc   :  { %1540 = vtanh.f32 %v1105_v0  ;;  %v1025_v44 = vpop.xlane.xlu0 %1024 }
 0x1bd   :  { %v1067_v6 = vadd.f32 %v1025_v44, %v540_v22 }
 0x1bf   :  { %v1090_v31 = vadd.f32 %v2038_v34, %v1067_v6 }
 0x1c0   :  { %v1028_v58 = vpop.xlane.xlu1 %1027 }
 0x1c1   :  { %v1106_v40 = vmul.f32 0.5, %v1090_v31  ;;  %v1068_v11 = vadd.f32 %v1028_v58, %v543_v63 }
 0x1c2   :  { %v1539_v30 = vpop.eup %1538  ;;  %v546_v57 = vpop.xlane.xlu0 %545 }
 0x1c3   :  { %1542 = vtanh.f32 %v1106_v40  ;;  %v1091_v54 = vadd.f32 %v2038_v34, %v1068_v11  ;;  %v1136_v13 = vmul.f32 0.5, %v1539_v30 }
 0x1c5   :  { %v1107_v37 = vmul.f32 0.5, %v1091_v54  ;;  %v1152_v18 = vadd.f32 0.5, %v1136_v13 }
 0x1c6   :  { %v549_v49 = vpop.xlane.xlu1 %548 }
 0x1c7   :  { %1544 = vtanh.f32 %v1107_v37  ;;  %1217 = vrot.lane.b32.xlu0 %v1152_v18, %s1595_s3  ;;  %v1168_v35 = vsub.f32 1.0, %v1152_v18 }
 0x1c8   :  { %v1031_v32 = vpop.xlane.xlu0 %1030 }
 0x1c9   :  { %v1541_v51 = vpop.eup %1540  ;;  %v1069_v2 = vadd.f32 %v1031_v32, %v546_v57  ;;  %1185 = vst.msk [vmem:[%s2205_s5] sm:$0xff] %vm1184_vm2, %v1168_v35 }
 0x1ca   :  { %v1137_v23 = vmul.f32 0.5, %v1541_v51 }
 0x1cb   :  { %v1092_v60 = vadd.f32 %v2038_v34, %v1069_v2 }
 0x1cc   :  { %v1153_v20 = vadd.f32 0.5, %v1137_v23 }
 0x1cd   :  { %v1108_v17 = vmul.f32 0.5, %v1092_v60  ;;  %v1034_v36 = vpop.xlane.xlu1 %1033 }
 0x1ce   :  { %v1070_v21 = vadd.f32 %v1034_v36, %v549_v49  ;;  %v552_v59 = vpop.xlane.xlu0 %551  ;;  %1219 = vrot.lane.b32.xlu1 %v1153_v20, %s1595_s3  ;;  %v1169_v46 = vsub.f32 1.0, %v1153_v20 }
 0x1cf   :  { %1546 = vtanh.f32 %v1108_v17 }
 0x1d0   :  { %v1543_v12 = vpop.eup %1542  ;;  %v1093_v5 = vadd.f32 %v2038_v34, %v1070_v21  ;;  %1186 = vst.msk [vmem:[%s2205_s5 + $0x8] sm:$0xff] %vm1184_vm2, %v1169_v46 }
 0x1d1   :  { %v1138_v10 = vmul.f32 0.5, %v1543_v12 }
 0x1d2   :  { %v1109_v28 = vmul.f32 0.5, %v1093_v5 }
 0x1d3   :  { %v1154_v9 = vadd.f32 0.5, %v1138_v10 }
 0x1d4   :  { %v1545_v26 = vpop.eup %1544  ;;  %1548 = vtanh.f32 %v1109_v28  ;;  %v555_v16 = vpop.xlane.xlu1 %554 }
 0x1d5   :  { %v1037_v27 = vpop.xlane.xlu0 %1036  ;;  %1221 = vrot.lane.b32.xlu1 %v1154_v9, %s1595_s3  ;;  %v1170_v14 = vsub.f32 1.0, %v1154_v9  ;;  %v1139_v42 = vmul.f32 0.5, %v1545_v26 }
 0x1d6   :  { %v1071_v38 = vadd.f32 %v1037_v27, %v552_v59 }
 0x1d7   :  { %v1155_v43 = vadd.f32 0.5, %v1139_v42  ;;  %1187 = vst.msk [vmem:[%s2205_s5 + $0x10] sm:$0xff] %vm1184_vm2, %v1170_v14 }
 0x1d8   :  { %v1094_v29 = vadd.f32 %v2038_v34, %v1071_v38 }
 0x1d9   :  { %v1171_v48 = vsub.f32 1.0, %v1155_v43  ;;  %1223 = vrot.lane.b32.xlu1 %v1155_v43, %s1595_s3 }
 0x1da   :  { %v1110_v8 = vmul.f32 0.5, %v1094_v29  ;;  %v1040_v15 = vpop.xlane.xlu1 %1039 }
 0x1db   :  { %v1072_v47 = vadd.f32 %v1040_v15, %v555_v16  ;;  %v558_v4 = vpop.xlane.xlu0 %557  ;;  %1188 = vst.msk [vmem:[%s2205_s5 + $0x18] sm:$0xff] %vm1184_vm2, %v1171_v48 }
 0x1dc   :  { %1550 = vtanh.f32 %v1110_v8  ;;  %v1547_v19 = vpop.eup %1546 }
 0x1dd   :  { %v1095_v61 = vadd.f32 %v2038_v34, %v1072_v47  ;;  %v1140_v53 = vmul.f32 0.5, %v1547_v19 }
 0x1df   :  { %v1111_v39 = vmul.f32 0.5, %v1095_v61  ;;  %v1156_v24 = vadd.f32 0.5, %v1140_v53  ;;  %v561_v33 = vpop.xlane.xlu1 %560 }
 0x1e0   :  { %v1043_v52 = vpop.xlane.xlu0 %1042 }
 0x1e1   :  { %v1549_v50 = vpop.eup %1548  ;;  %1552 = vtanh.f32 %v1111_v39  ;;  %v1073_v56 = vadd.f32 %v1043_v52, %v558_v4  ;;  %1225 = vrot.lane.b32.xlu0 %v1156_v24, %s1595_s3  ;;  %v1172_v45 = vsub.f32 1.0, %v1156_v24 }
 0x1e2   :  { %v1141_v62 = vmul.f32 0.5, %v1549_v50 }
 0x1e3   :  { %v1096_v7 = vadd.f32 %v2038_v34, %v1073_v56  ;;  %1189 = vst.msk [vmem:[%s2205_s5 + $0x20] sm:$0xff] %vm1184_vm2, %v1172_v45 }
 0x1e4   :  { %v1046_v41 = vpop.xlane.xlu1 %1045  ;;  %v1157_v55 = vadd.f32 0.5, %v1141_v62 }
 0x1e5   :  { %v1112_v22 = vmul.f32 0.5, %v1096_v7  ;;  %v1074_v1 = vadd.f32 %v1046_v41, %v561_v33  ;;  %v564_v3 = vpop.xlane.xlu0 %563 }
 0x1e6   :  { %v1173_v25 = vsub.f32 1.0, %v1157_v55  ;;  %1227 = vrot.lane.b32.xlu1 %v1157_v55, %s1595_s3 }
 0x1e7   :  { %1554 = vtanh.f32 %v1112_v22  ;;  %v1097_v0 = vadd.f32 %v2038_v34, %v1074_v1 }
 0x1e8   :  { %v567_v44 = vpop.xlane.xlu1 %566  ;;  %1190 = vst.msk [vmem:[%s2205_s5 + $0x28] sm:$0xff] %vm1184_vm2, %v1173_v25 }
 0x1e9   :  { %v1551_v63 = vpop.eup %1550  ;;  %v1113_v6 = vmul.f32 0.5, %v1097_v0  ;;  %v1049_v31 = vpop.xlane.xlu0 %1048 }
 0x1ea   :  { %v1142_v58 = vmul.f32 0.5, %v1551_v63  ;;  %v1075_v40 = vadd.f32 %v1049_v31, %v564_v3 }
 0x1eb   :  { %1556 = vtanh.f32 %v1113_v6 }
 0x1ec   :  { %v1158_v11 = vadd.f32 0.5, %v1142_v58  ;;  %v1098_v30 = vadd.f32 %v2038_v34, %v1075_v40  ;;  %v1052_v57 = vpop.xlane.xlu1 %1051 }
 0x1ed   :  { %v1076_v54 = vadd.f32 %v1052_v57, %v567_v44  ;;  %v570_v13 = vpop.xlane.xlu0 %569 }
 0x1ee   :  { %1229 = vrot.lane.b32.xlu0 %v1158_v11, %s1595_s3  ;;  %v1174_v37 = vsub.f32 1.0, %v1158_v11  ;;  %v1553_v18 = vpop.eup %1552  ;;  %v1114_v49 = vmul.f32 0.5, %v1098_v30 }
 0x1ef   :  { %v1099_v35 = vadd.f32 %v2038_v34, %v1076_v54  ;;  %v1143_v32 = vmul.f32 0.5, %v1553_v18 }
 0x1f0   :  { %1191 = vst.msk [vmem:[%s2205_s5 + $0x30] sm:$0xff] %vm1184_vm2, %v1174_v37  ;;  %1558 = vtanh.f32 %v1114_v49  ;;  %v573_v51 = vpop.xlane.xlu1 %572 }
 0x1f1   :  { %v1115_v2 = vmul.f32 0.5, %v1099_v35  ;;  %v1055_v23 = vpop.xlane.xlu0 %1054  ;;  %v1159_v60 = vadd.f32 0.5, %v1143_v32 }
 0x1f2   :  { %v1077_v20 = vadd.f32 %v1055_v23, %v570_v13 }
 0x1f3   :  { %1560 = vtanh.f32 %v1115_v2  ;;  %v1175_v17 = vsub.f32 1.0, %v1159_v60  ;;  %1231 = vrot.lane.b32.xlu1 %v1159_v60, %s1595_s3 }
 0x1f4   :  { %v1555_v36 = vpop.eup %1554  ;;  %v1100_v21 = vadd.f32 %v2038_v34, %v1077_v20  ;;  %v1058_v59 = vpop.xlane.xlu1 %1057 }
 0x1f5   :  { %v1078_v46 = vadd.f32 %v1058_v59, %v573_v51  ;;  %v576_v12 = vpop.xlane.xlu0 %575  ;;  %v1144_v5 = vmul.f32 0.5, %v1555_v36  ;;  %1192 = vst.msk [vmem:[%s2205_s5 + $0x38] sm:$0xff] %vm1184_vm2, %v1175_v17 }
 0x1f6   :  { %v1116_v10 = vmul.f32 0.5, %v1100_v21 }
 0x1f7   :  { %v1101_v28 = vadd.f32 %v2038_v34, %v1078_v46  ;;  %v1160_v9 = vadd.f32 0.5, %v1144_v5 }
 0x1f8   :  { %v1557_v26 = vpop.eup %1556  ;;  %1562 = vtanh.f32 %v1116_v10  ;;  %v579_v16 = vpop.xlane.xlu1 %578 }
 0x1f9   :  { %v1117_v27 = vmul.f32 0.5, %v1101_v28  ;;  %v1061_v38 = vpop.xlane.xlu0 %1060  ;;  %1233 = vrot.lane.b32.xlu0 %v1160_v9, %s1595_s3  ;;  %v1176_v14 = vsub.f32 1.0, %v1160_v9  ;;  %v1145_v42 = vmul.f32 0.5, %v1557_v26 }
 0x1fa   :  { %v1079_v29 = vadd.f32 %v1061_v38, %v576_v12 }
 0x1fb   :  { %1564 = vtanh.f32 %v1117_v27  ;;  %v1161_v43 = vadd.f32 0.5, %v1145_v42  ;;  %1193 = vst.msk [vmem:[%s2205_s5 + $0x40] sm:$0xff] %vm1184_vm2, %v1176_v14 }
 0x1fc   :  { %v1102_v8 = vadd.f32 %v2038_v34, %v1079_v29  ;;  %v1064_v48 = vpop.xlane.xlu1 %1063 }
 0x1fd   :  { %v1559_v15 = vpop.eup %1558  ;;  %v1080_v47 = vadd.f32 %v1064_v48, %v579_v16  ;;  %v1177_v4 = vsub.f32 1.0, %v1161_v43  ;;  %1235 = vrot.lane.b32.xlu1 %v1161_v43, %s1595_s3 }
 0x1fe   :  { %v1118_v19 = vmul.f32 0.5, %v1102_v8  ;;  %v1146_v61 = vmul.f32 0.5, %v1559_v15 }
 0x1ff   :  { %v1103_v53 = vadd.f32 %v2038_v34, %v1080_v47  ;;  %1194 = vst.msk [vmem:[%s2205_s5 + $0x48] sm:$0xff] %vm1184_vm2, %v1177_v4 }
 0x200   :  { %v1561_v39 = vpop.eup %1560  ;;  %1566 = vtanh.f32 %v1118_v19  ;;  %v1162_v24 = vadd.f32 0.5, %v1146_v61 }
 0x201   :  { %v1119_v33 = vmul.f32 0.5, %v1103_v53  ;;  %v1147_v52 = vmul.f32 0.5, %v1561_v39 }
 0x202   :  { %1237 = vrot.lane.b32.xlu0 %v1162_v24, %s1595_s3  ;;  %v1178_v50 = vsub.f32 1.0, %v1162_v24 }
 0x203   :  { %1568 = vtanh.f32 %v1119_v33  ;;  %v1163_v56 = vadd.f32 0.5, %v1147_v52 }
 0x204   :  { %1195 = vst.msk [vmem:[%s2205_s5 + $0x50] sm:$0xff] %vm1184_vm2, %v1178_v50 }
 0x205   :  { %v1563_v34 = vpop.eup %1562  ;;  %v1179_v45 = vsub.f32 1.0, %v1163_v56  ;;  %1239 = vrot.lane.b32.xlu1 %v1163_v56, %s1595_s3 }
 0x206   :  { %v1148_v62 = vmul.f32 0.5, %v1563_v34 }
 0x207   :  { %1196 = vst.msk [vmem:[%s2205_s5 + $0x58] sm:$0xff] %vm1184_vm2, %v1179_v45 }
 0x208   :  { %v1565_v7 = vpop.eup %1564  ;;  %v1164_v41 = vadd.f32 0.5, %v1148_v62 }
 0x209   :  { %v1149_v55 = vmul.f32 0.5, %v1565_v7 }
 0x20a   :  { %1241 = vrot.lane.b32.xlu0 %v1164_v41, %s1595_s3  ;;  %v1180_v22 = vsub.f32 1.0, %v1164_v41 }
 0x20b   :  { %v1165_v1 = vadd.f32 0.5, %v1149_v55 }
 0x20c   :  { %1197 = vst.msk [vmem:[%s2205_s5 + $0x60] sm:$0xff] %vm1184_vm2, %v1180_v22 }
 0x20d   :  { %v1567_v3 = vpop.eup %1566  ;;  %v1181_v25 = vsub.f32 1.0, %v1165_v1  ;;  %1243 = vrot.lane.b32.xlu1 %v1165_v1, %s1595_s3 }
 0x20e   :  { %v1150_v0 = vmul.f32 0.5, %v1567_v3 }
 0x20f   :  { %1198 = vst.msk [vmem:[%s2205_s5 + $0x68] sm:$0xff] %vm1184_vm2, %v1181_v25 }
 0x210   :  { %v1569_v63 = vpop.eup %1568  ;;  %v1166_v44 = vadd.f32 0.5, %v1150_v0 }
 0x211   :  { %v1151_v6 = vmul.f32 0.5, %v1569_v63 }
 0x212   :  { %1245 = vrot.lane.b32.xlu0 %v1166_v44, %s1595_s3  ;;  %v1182_v31 = vsub.f32 1.0, %v1166_v44 }
 0x213   :  { %v1167_v58 = vadd.f32 0.5, %v1151_v6 }
 0x214   :  { %1199 = vst.msk [vmem:[%s2205_s5 + $0x70] sm:$0xff] %vm1184_vm2, %v1182_v31 }
 0x215   :  { %v1183_v40 = vsub.f32 1.0, %v1167_v58  ;;  %1247 = vrot.lane.b32.xlu1 %v1167_v58, %s1595_s3 }
 0x217   :  { %1200 = vst.msk [vmem:[%s2205_s5 + $0x78] sm:$0xff] %vm1184_vm2, %v1183_v40 }
 0x239   :  { %v1218_v11 = vpop.permute.xlu0 %1217 }
 0x23a   :  { %1266 = vst.msk [vmem:[%s2205_s5] sm:$0xff] %vm1265_vm3, %v1218_v11 }
 0x240   :  { %v1220_v30 = vpop.permute.xlu1 %1219 }
 0x241   :  { %1267 = vst.msk [vmem:[%s2205_s5 + $0x8] sm:$0xff] %vm1265_vm3, %v1220_v30 }
 0x247   :  { %v1222_v57 = vpop.permute.xlu1 %1221 }
 0x248   :  { %1268 = vst.msk [vmem:[%s2205_s5 + $0x10] sm:$0xff] %vm1265_vm3, %v1222_v57 }
 0x24b   :  { %v1224_v54 = vpop.permute.xlu1 %1223 }
 0x24c   :  { %1269 = vst.msk [vmem:[%s2205_s5 + $0x18] sm:$0xff] %vm1265_vm3, %v1224_v54 }
 0x253   :  { %v1226_v13 = vpop.permute.xlu0 %1225 }
 0x254   :  { %1270 = vst.msk [vmem:[%s2205_s5 + $0x20] sm:$0xff] %vm1265_vm3, %v1226_v13 }
 0x258   :  { %v1228_v37 = vpop.permute.xlu1 %1227 }
 0x259   :  { %1271 = vst.msk [vmem:[%s2205_s5 + $0x28] sm:$0xff] %vm1265_vm3, %v1228_v37 }
 0x260   :  { %v1230_v18 = vpop.permute.xlu0 %1229 }
 0x261   :  { %1272 = vst.msk [vmem:[%s2205_s5 + $0x30] sm:$0xff] %vm1265_vm3, %v1230_v18 }
 0x265   :  { %v1232_v49 = vpop.permute.xlu1 %1231 }
 0x266   :  { %1273 = vst.msk [vmem:[%s2205_s5 + $0x38] sm:$0xff] %vm1265_vm3, %v1232_v49 }
 0x26b   :  { %v1234_v35 = vpop.permute.xlu0 %1233 }
 0x26c   :  { %1274 = vst.msk [vmem:[%s2205_s5 + $0x40] sm:$0xff] %vm1265_vm3, %v1234_v35 }
 0x26f   :  { %v1236_v32 = vpop.permute.xlu1 %1235 }
 0x270   :  { %1275 = vst.msk [vmem:[%s2205_s5 + $0x48] sm:$0xff] %vm1265_vm3, %v1236_v32 }
 0x274   :  { %v1238_v51 = vpop.permute.xlu0 %1237 }
 0x275   :  { %1276 = vst.msk [vmem:[%s2205_s5 + $0x50] sm:$0xff] %vm1265_vm3, %v1238_v51 }
 0x277   :  { %v1240_v2 = vpop.permute.xlu1 %1239 }
 0x278   :  { %1277 = vst.msk [vmem:[%s2205_s5 + $0x58] sm:$0xff] %vm1265_vm3, %v1240_v2 }
 0x27c   :  { %v1242_v23 = vpop.permute.xlu0 %1241 }
 0x27d   :  { %1278 = vst.msk [vmem:[%s2205_s5 + $0x60] sm:$0xff] %vm1265_vm3, %v1242_v23 }
 0x27f   :  { %v1244_v60 = vpop.permute.xlu1 %1243 }
 0x280   :  { %1279 = vst.msk [vmem:[%s2205_s5 + $0x68] sm:$0xff] %vm1265_vm3, %v1244_v60 }
 0x284   :  { %v1246_v20 = vpop.permute.xlu0 %1245 }
 0x285   :  { %1280 = vst.msk [vmem:[%s2205_s5 + $0x70] sm:$0xff] %vm1265_vm3, %v1246_v20 }
 0x287   :  { %v1248_v17 = vpop.permute.xlu1 %1247 }
 0x288   :  { %1281 = vst.msk [vmem:[%s2205_s5 + $0x78] sm:$0xff] %vm1265_vm3, %v1248_v17 }
 0x289   :  { %1286 = vsyncpa [#allocation4], 1 }

</bundles_post_ra>
